<compile_context>
chip_gen: v6e
topology: v6e:2x2x1
jax: 0.10.0
libtpu: 0.0.40
codegen_flags: <defaults>
</compile_context>

<pallas_src>
import functools

import jax
import jax.numpy as jnp
from jax.experimental import pallas as pl
from jax.experimental.pallas import tpu as pltpu

# --- problem sizes implied by the module ---
M_UE = 5
N_BS = 5
K = 20
ACT_DIM = M_UE + M_UE                 # 10
OBS_DIM = 4 * M_UE + K                # tasks, d, rho, tau (M_UE each) + beta (K) = 40
HIDDEN = 128
LANE = 128                            # padded output width -> lane-dense stores


def _round_up(n, m):
    return (n + m - 1) // m * m


def actor_kernel(x_ref, w1_ref, b1_ref, w2_ref, b2_ref, o_ref):
    # layer 1: (tm, obs) @ (obs, 128) — f32 operands, f32 accumulate on MXU
    h = jnp.dot(x_ref[...], w1_ref[...],
                preferred_element_type=jnp.float32,
                precision=jax.lax.Precision.HIGHEST) + b1_ref[...]
    h = jnp.maximum(h, 0.0)                                   # ReLU (VPU)
    # layer 2: (tm, 128) @ (128, 128-padded)
    y = jnp.dot(h, w2_ref[...],
                preferred_element_type=jnp.float32,
                precision=jax.lax.Precision.HIGHEST) + b2_ref[...]
    # tanh on EUP; store bf16 to halve the dominant output writeback
    o_ref[...] = jnp.tanh(y).astype(o_ref.dtype)


def prepare_actor_params(w1, b1, w2, b2):
    """One-time layout prep (call OUTSIDE the per-step forward):
    pad layer-2 weight/bias to a full 128-lane register, make biases rank-2.
    Everything stays f32 — the kernel is memory-bound, so bf16 operands would
    only loosen numerics without buying time."""
    hidden = w1.shape[1]
    act_dim = w2.shape[1]
    n_pad = _round_up(act_dim, LANE)
    w2p = jnp.zeros((hidden, n_pad), jnp.float32).at[:, :act_dim].set(w2)
    b2p = jnp.zeros((1, n_pad), jnp.float32).at[:, :act_dim].set(
        jnp.reshape(b2, (1, -1)))
    b1p = jnp.reshape(b1, (1, -1)).astype(jnp.float32)
    return (w1.astype(jnp.float32), b1p, w2p, b2p, act_dim)


@functools.partial(jax.jit, static_argnames=("act_dim", "tm_max"))
def _actor_forward_prepared(x, w1, b1p, w2p, b2p, *, act_dim, tm_max=512):
    B, obs_dim = x.shape
    hidden = w1.shape[1]
    n_pad = w2p.shape[1]

    # ---- batch tiling (all static: shapes known at trace time) ----
    # * no jnp.pad: ragged last tile, masked writeback (see invariant above)
    # * >=2 roughly equal tiles when B is large enough so the "parallel" axis
    #   shards across both v7x TensorCores; single full-extent tile otherwise
    n_tiles = max(1, pl.cdiv(B, tm_max))
    if B >= 32:
        n_tiles = max(n_tiles, 2)
    if n_tiles == 1:
        tm = B                                  # block dim == full array dim
    else:
        tm = _round_up(pl.cdiv(B, n_tiles), 16)  # 16: safe sublane multiple
    grid = (pl.cdiv(B, tm),)

    out = pl.pallas_call(
        actor_kernel,
        out_shape=jax.ShapeDtypeStruct((B, n_pad), jnp.bfloat16),
        grid_spec=pltpu.PrefetchScalarGridSpec(
            num_scalar_prefetch=0,
            grid=grid,
            in_specs=[
                # x: tiled along batch, pipelined (double-buffered) by BlockSpec
                pl.BlockSpec((tm, obs_dim), lambda i: (i, 0)),
                # weights/biases: single full blocks, resident across all steps
                pl.BlockSpec((obs_dim, hidden), lambda i: (0, 0)),
                pl.BlockSpec((1, hidden), lambda i: (0, 0)),
                pl.BlockSpec((hidden, n_pad), lambda i: (0, 0)),
                pl.BlockSpec((1, n_pad), lambda i: (0, 0)),
            ],
            out_specs=pl.BlockSpec((tm, n_pad), lambda i: (i, 0)),
        ),
        compiler_params=pltpu.CompilerParams(
            # independent batch tiles -> megacore sharding on v7x
            dimension_semantics=("parallel",),
        ),
    )(x, w1, b1p, w2p, b2p)

    # slice off the lane padding; return f32 like the nn.Module
    return out[:, :act_dim].astype(jnp.float32)


def actor_forward(x, params, *, tm_max=512):
    """x: (B, obs_dim) f32, params from prepare_actor_params -> (B, act_dim) f32."""
    w1, b1p, w2p, b2p, act_dim = params
    return _actor_forward_prepared(x, w1, b1p, w2p, b2p,
                                   act_dim=act_dim, tm_max=tm_max)


def init_actor_params(key, obs_dim=OBS_DIM, hidden=HIDDEN, act_dim=ACT_DIM):
    """Deterministic init matching nn.Linear's U(-1/sqrt(fan_in), 1/sqrt(fan_in))."""
    k1, k2, k3, k4 = jax.random.split(key, 4)
    bound1 = 1.0 / jnp.sqrt(jnp.float32(obs_dim))
    bound2 = 1.0 / jnp.sqrt(jnp.float32(hidden))
    w1 = jax.random.uniform(k1, (obs_dim, hidden), jnp.float32, -bound1, bound1)
    b1 = jax.random.uniform(k2, (1, hidden), jnp.float32, -bound1, bound1)
    w2 = jax.random.uniform(k3, (hidden, act_dim), jnp.float32, -bound2, bound2)
    b2 = jax.random.uniform(k4, (1, act_dim), jnp.float32, -bound2, bound2)
    return w1, b1, w2, b2


def _reference(x, w1, b1, w2, b2):
    hi = jnp.dot(x, w1, precision=jax.lax.Precision.HIGHEST) + b1
    hi = jnp.maximum(hi, 0.0)
    return jnp.tanh(jnp.dot(hi, w2, precision=jax.lax.Precision.HIGHEST) + b2)


if __name__ == "__main__":
    key = jax.random.PRNGKey(0)
    k_x, k_x2, k_p = jax.random.split(key, 3)

    w1, b1, w2, b2 = init_actor_params(k_p)
    params = prepare_actor_params(w1, b1, w2, b2)     # one-time layout prep

    # B=200: two parallel batch tiles + a ragged (masked) last tile.
    batch = 200
    x = jax.random.normal(k_x, (batch, OBS_DIM), jnp.float32)
    out = jax.block_until_ready(actor_forward(x, params))
    ref = _reference(x, w1, b1, w2, b2)
    assert out.shape == (batch, ACT_DIM)
    # f32 math in-kernel; only bf16 output rounding remains (~4e-3 abs on tanh)
    assert jnp.allclose(out, ref, atol=1e-2, rtol=0.0), float(
        jnp.max(jnp.abs(out - ref)))

    # B=5: one env step (N_BS observations) — single full-extent tile path.
    x_small = jax.random.normal(k_x2, (N_BS, OBS_DIM), jnp.float32)
    out_small = jax.block_until_ready(actor_forward(x_small, params))
    ref_small = _reference(x_small, w1, b1, w2, b2)
    assert out_small.shape == (N_BS, ACT_DIM)
    assert jnp.allclose(out_small, ref_small, atol=1e-2, rtol=0.0), float(
        jnp.max(jnp.abs(out_small - ref_small)))

    print("KERNEL_OK")
</pallas_src>

<mosaic_0001>
module attributes {stable_mosaic.version = 11 : i64} {
  func.func @actor_kernel(%arg0: i32, %arg1: memref<112x40xf32, #tpu.memory_space<vmem>>, %arg2: memref<40x128xf32, #tpu.memory_space<vmem>>, %arg3: memref<1x128xf32, #tpu.memory_space<vmem>>, %arg4: memref<128x128xf32, #tpu.memory_space<vmem>>, %arg5: memref<1x128xf32, #tpu.memory_space<vmem>>, %arg6: memref<112x128xbf16, #tpu.memory_space<vmem>>) attributes {dimension_semantics = [#tpu.dimension_semantics<parallel>], iteration_bounds = array<i64: 2>, scalar_prefetch = 0 : i64, scratch_operands = 0 : i64, tpu.core_type = #tpu.core_type<tc>, window_params = [{transform_indices = @transform_0, window_bounds = array<i64: 112, 40>}, {pipeline_mode = #tpu.pipeline_mode<synchronous>, transform_indices = @transform_1, window_bounds = array<i64: 40, 128>}, {pipeline_mode = #tpu.pipeline_mode<synchronous>, transform_indices = @transform_2, window_bounds = array<i64: 1, 128>}, {pipeline_mode = #tpu.pipeline_mode<synchronous>, transform_indices = @transform_3, window_bounds = array<i64: 128, 128>}, {pipeline_mode = #tpu.pipeline_mode<synchronous>, transform_indices = @transform_4, window_bounds = array<i64: 1, 128>}, {transform_indices = @transform_5, window_bounds = array<i64: 112, 128>}]} {
    %c0 = arith.constant 0 : index
    %c0_0 = arith.constant 0 : index
    %0 = vector.load %arg1[%c0, %c0_0] : memref<112x40xf32, #tpu.memory_space<vmem>>, vector<112x40xf32>
    %c0_1 = arith.constant 0 : index
    %c0_2 = arith.constant 0 : index
    %1 = vector.load %arg2[%c0_1, %c0_2] : memref<40x128xf32, #tpu.memory_space<vmem>>, vector<40x128xf32>
    %cst = arith.constant dense<0.000000e+00> : vector<112x128xf32>
    %2 = tpu.matmul %0, %1, %cst {dimension_numbers = #tpu.dot_dimension_numbers<[1], [0], [0], [1], [0, 0, 1, 1], [], []>, precision = #tpu.contract_precision<fp32>} : vector<112x40xf32>, vector<40x128xf32>, vector<112x128xf32> -> vector<112x128xf32>
    %c0_3 = arith.constant 0 : index
    %c0_4 = arith.constant 0 : index
    %3 = vector.load %arg3[%c0_3, %c0_4] : memref<1x128xf32, #tpu.memory_space<vmem>>, vector<1x128xf32>
    %4 = vector.broadcast %3 : vector<1x128xf32> to vector<112x128xf32>
    %5 = arith.addf %2, %4 : vector<112x128xf32>
    %cst_5 = arith.constant 0.000000e+00 : f32
    %6 = vector.broadcast %cst_5 : f32 to vector<112x128xf32>
    %7 = arith.maximumf %5, %6 : vector<112x128xf32>
    %c0_6 = arith.constant 0 : index
    %c0_7 = arith.constant 0 : index
    %8 = vector.load %arg4[%c0_6, %c0_7] : memref<128x128xf32, #tpu.memory_space<vmem>>, vector<128x128xf32>
    %cst_8 = arith.constant dense<0.000000e+00> : vector<112x128xf32>
    %9 = tpu.matmul %7, %8, %cst_8 {dimension_numbers = #tpu.dot_dimension_numbers<[1], [0], [0], [1], [0, 0, 1, 1], [], []>, precision = #tpu.contract_precision<fp32>} : vector<112x128xf32>, vector<128x128xf32>, vector<112x128xf32> -> vector<112x128xf32>
    %c0_9 = arith.constant 0 : index
    %c0_10 = arith.constant 0 : index
    %10 = vector.load %arg5[%c0_9, %c0_10] : memref<1x128xf32, #tpu.memory_space<vmem>>, vector<1x128xf32>
    %11 = vector.broadcast %10 : vector<1x128xf32> to vector<112x128xf32>
    %12 = arith.addf %9, %11 : vector<112x128xf32>
    %13 = math.tanh %12 : vector<112x128xf32>
    %14 = arith.truncf %13 : vector<112x128xf32> to vector<112x128xbf16>
    %c0_11 = arith.constant 0 : index
    %c0_12 = arith.constant 0 : index
    %15 = vector.load %arg6[%c0_11, %c0_12] : memref<112x128xbf16, #tpu.memory_space<vmem>>, vector<112x128xbf16>
    tpu.vector_store %arg6[%c0_11, %c0_12], %14 {strides = array<i32>} : memref<112x128xbf16, #tpu.memory_space<vmem>>, vector<112x128xbf16>,
    return
  }
  func.func @transform_0(%arg0: i32) -> (i32, i32) {
    %c0_i32 = arith.constant 0 : i32
    %c0_i32_0 = arith.constant 0 : i32
    return %arg0, %c0_i32 : i32, i32
  }
  func.func @transform_1(%arg0: i32) -> (i32, i32) {
    %c0_i32 = arith.constant 0 : i32
    %c0_i32_0 = arith.constant 0 : i32
    %c0_i32_1 = arith.constant 0 : i32
    return %c0_i32, %c0_i32_0 : i32, i32
  }
  func.func @transform_2(%arg0: i32) -> (i32, i32) {
    %c0_i32 = arith.constant 0 : i32
    %c0_i32_0 = arith.constant 0 : i32
    %c0_i32_1 = arith.constant 0 : i32
    return %c0_i32, %c0_i32_0 : i32, i32
  }
  func.func @transform_3(%arg0: i32) -> (i32, i32) {
    %c0_i32 = arith.constant 0 : i32
    %c0_i32_0 = arith.constant 0 : i32
    %c0_i32_1 = arith.constant 0 : i32
    return %c0_i32, %c0_i32_0 : i32, i32
  }
  func.func @transform_4(%arg0: i32) -> (i32, i32) {
    %c0_i32 = arith.constant 0 : i32
    %c0_i32_0 = arith.constant 0 : i32
    %c0_i32_1 = arith.constant 0 : i32
    return %c0_i32, %c0_i32_0 : i32, i32
  }
  func.func @transform_5(%arg0: i32) -> (i32, i32) {
    %c0_i32 = arith.constant 0 : i32
    %c0_i32_0 = arith.constant 0 : i32
    return %arg0, %c0_i32 : i32, i32
  }
}

</mosaic_0001>

<bundles_post_ra>
// kernel: _actor_forward_prepared.1
= control target key start
LH: loop header
LB: loop body
LE: loop exit
PB: predicated region body
PF: predicated region fallthrough
CT: control target
= control target key end

     0   :  { %s4090_s18 = smov 0   ;;  %s4092_s19 = smov 0   ;;  %s5386_s0 = inlined_call_operand.vmem [shape: f32[200,40], index: 0, kind: input, shape index: {}]   ;;  %s5387_s1 = inlined_call_operand.vmem [shape: f32[40,128], index: 1, kind: input, shape index: {}]   ;;  %s5388_s2 = inlined_call_operand.vmem [shape: f32[1,128], index: 2, kind: input, shape index: {}]   ;;  %s5389_s3 = inlined_call_operand.vmem [shape: f32[128,128], index: 3, kind: input, shape index: {}]   ;;  %s5390_s4 = inlined_call_operand.vmem [shape: f32[1,128], index: 4, kind: input, shape index: {}]   ;;  %s5391_s5 = inlined_call_operand.vmem [shape: bf16[200,128], index: 5, kind: output, shape index: {}]  }
   0x1   :  { %s4094_s20 = smov 0  }
   0x2 LB: > { %s4103_s21 = sadd.s32 4294967295, %s4026_s20   ;;  %s4105_s22 = sadd.s32 1, %s4026_s20   ;;  %s4026_s20 = sphi %s4094_s20, %s5611_s20   ;;  %s4022_s19 = sphi %s4092_s19, %s5610_s19   ;;  %s4018_s18 = sphi %s4090_s18, %s5609_s18  }
   0x3   : > { %s129_s23 = ssub.s32 %s4026_s20, %s4105_s22  ;;  %s132_s24 = sadd.s32 1, %s4022_s19 }
   0x4   : > { %p130_p0 = scmp.eq.s32.totalorder %s129_s23, 0  ;;  %p142_p1 = scmp.ne.s32.totalorder %s4022_s19, %s4018_s18 }
   0x5   : > { %p143_p2 = scmp.eq.s32.totalorder %s4103_s21, 1  ;;  %p2966_p3 = scmp.ge.s32.totalorder %s4026_s20, 1 }
   0x6   : > { %s4113_s25 = scalar_select %p130_p0, %s4022_s19, %s132_s24  }
   0x7   : > { %p4115_p4 = por %p143_p2, %p142_p1  ;;  %p196_p5 = scmp.lt.s32.totalorder %s4026_s20, 3 }
   0x9   : > { %p197_p6 = pnand %p2966_p3, %p196_p5 }
   0xb   : > { %200 = sbr.rel (%p197_p6) target bundleno = 698 (0x2ba), region = 40 }
  0x10   : > { %v264_v0 = vld [vmem:[%s5387_s1 + $0x20] sm:$0xff]  ;;  %v263_v1 = vld [vmem:[%s5387_s1 + $0x18] sm:$0xff]  ;;  %v262_v2 = vld [vmem:[%s5387_s1 + $0x10] sm:$0xff]  ;;  %s4129_s8 = smul.u32 14, %s4103_s21  ;;  %vm272_vm0 = vcmask 326656   ;;  %s224_s20 = sand.u32 1, %s4018_s18  }
  0x11   : > { %v4131_v3 = vand.u32 4294901760, %v264_v0  ;;  %v4133_v4 = vand.u32 4294901760, %v263_v1  ;;  %v4135_v5 = vand.u32 4294901760, %v262_v2  ;;  %v261_v6 = vld [vmem:[%s5387_s1 + $0x8] sm:$0xff]  ;;  %v260_v7 = vld [vmem:[%s5387_s1] sm:$0xff]  ;;  %s3850_s18 = smul.u32 56, %s224_s20 }
  0x12   : > { %v4143_v8 = vand.u32 4294901760, %v261_v6  ;;  %v4145_v9 = vand.u32 4294901760, %v260_v7  ;;  %p232_p7 = scmp.lt.s32.totalorder %s4129_s8, 24  ;;  %s2701_s24 = ssub.s32 (%p4115_p4), 25, %s4129_s8 }
  0x13   : > { %3346 = vmatprep.subr.mxu0 %v4131_v3  ;;  %v4150_v10 = vsub.f32 %v264_v0, %v4131_v3  ;;  %v4153_v11 = vsub.f32 %v263_v1, %v4133_v4  ;;  %v4156_v12 = vsub.f32 %v262_v2, %v4135_v5  ;;  %s5297_s23 = scalar_lea.vmem [#allocation2], %s3850_s18   ;;  %s3010_s27 = smul.u32 (%p4115_p4), 56, %s4103_s21 }
  0x14   : > { %3347 = vmatpush3.msra.mxu0 %v4131_v3  ;;  %v4160_v13 = vsub.f32 %v261_v6, %v4143_v8  ;;  %v4163_v14 = vsub.f32 %v260_v7, %v4145_v9  ;;  %s233_s13 = scalar_select %p232_p7, %s4129_s8, 24 }
  0x15   : > { %v4167_v15 = vand.u32 4294901760, %v4150_v10  ;;  %3348 = vmatprep.subr.mxu0 %v4133_v4  ;;  %v4171_v16 = vand.u32 4294901760, %v4153_v11  ;;  %v4174_v17 = vand.u32 4294901760, %v4156_v12  ;;  %p2702_p8 = scmp.lt.s32.totalorder (%p4115_p4), %s2701_s24, 14  ;;  %s5315_s30 = scalar_lea.vmem (%p4115_p4), %s5391_s5, %s3010_s27  }
  0x16   : > { %3349 = vmatpush3.msra.mxu0 %v4133_v4  ;;  %v4178_v18 = vand.u32 4294901760, %v4160_v13  ;;  %v4181_v19 = vand.u32 4294901760, %v4163_v14  ;;  %s2967_s14 = sshll.u32 %s233_s13, 3 }
  0x17   : > { %v551_v20 = vsub.f32 %v4150_v10, %v4167_v15  ;;  %v558_v21 = vsub.f32 %v4153_v11, %v4171_v16  ;;  %3350 = vmatprep.subr.mxu0 %v4135_v5  ;;  %v565_v22 = vsub.f32 %v4156_v12, %v4174_v17  ;;  %s4193_s17 = scalar_lea.vmem %s5386_s0, %s2967_s14 }
  0x18   : > { %3351 = vmatpush3.msra.mxu0 %v4135_v5  ;;  %v572_v23 = vsub.f32 %v4160_v13, %v4178_v18  ;;  %v579_v24 = vsub.f32 %v4163_v14, %v4181_v19  ;;  %v246_v25 = vld [vmem:[%s4193_s17] sm:$0xff]  ;;  %v247_v26 = vld [vmem:[%s4193_s17 + $0x8] sm:$0xff]  ;;  %v248_v27 = vld [vmem:[%s4193_s17 + $0x10] sm:$0xff] }
  0x19   : > { %v552_v28 = vand.u32 4294901760, %v551_v20  ;;  %v559_v29 = vand.u32 4294901760, %v558_v21  ;;  %v566_v30 = vand.u32 4294901760, %v565_v22  ;;  %3352 = vmatprep.subr.mxu0 %v4143_v8  ;;  %v274_v31 = vsel %vm272_vm0, %v246_v25, 0  ;;  %v249_v32 = vld [vmem:[%s4193_s17 + $0x18] sm:$0xff]  ;;  %v250_v33 = vld [vmem:[%s4193_s17 + $0x20] sm:$0xff] }
  0x1a   : > { %3353 = vmatpush3.msra.mxu0 %v4143_v8  ;;  %v573_v34 = vand.u32 4294901760, %v572_v23  ;;  %v580_v35 = vand.u32 4294901760, %v579_v24  ;;  %v4208_v36 = vand.u32 4294901760, %v274_v31  ;;  %v277_v37 = vsel %vm272_vm0, %v247_v26, 0  ;;  %v251_v38 = vld [vmem:[%s4193_s17 + $0x28] sm:$0xff]  ;;  %v252_v39 = vld [vmem:[%s4193_s17 + $0x30] sm:$0xff] }
  0x1b   : > { %3377 = vmatprep.subr.mxu1 %v552_v28  ;;  %3354 = vmatprep.subr.mxu0 %v4145_v9  ;;  %v4214_v40 = vand.u32 4294901760, %v277_v37  ;;  %v280_v41 = vsel %vm272_vm0, %v248_v27, 0  ;;  %v283_v42 = vsel %vm272_vm0, %v249_v32, 0  ;;  %v286_v43 = vsel %vm272_vm0, %v250_v33, 0  ;;  %v253_v44 = vld [vmem:[%s4193_s17 + $0x38] sm:$0xff]  ;;  %v254_v20 = vld [vmem:[%s4193_s17 + $0x40] sm:$0xff] }
  0x1c   : > { %3378 = vmatpush3.msra.mxu1 %v552_v28  ;;  %3355 = vmatpush3.msra.mxu0 %v4145_v9  ;;  %v4222_v45 = vsub.f32 %v274_v31, %v4208_v36  ;;  %v4224_v46 = vand.u32 4294901760, %v280_v41  ;;  %v4226_v47 = vand.u32 4294901760, %v283_v42  ;;  %v4228_v48 = vand.u32 4294901760, %v286_v43  ;;  %v255_v25 = vld [vmem:[%s4193_s17 + $0x48] sm:$0xff]  ;;  %v256_v26 = vld [vmem:[%s4193_s17 + $0x50] sm:$0xff]  ;;  %v257_v31 = vld [vmem:[%s4193_s17 + $0x58] sm:$0xff] }
  0x1d   : > { %3379 = vmatprep.subr.mxu1 %v559_v29  ;;  %3387 = vmatprep.mubr.f32.mxu1 %v4208_v36  ;;  %v4232_v49 = vsub.f32 %v277_v37, %v4214_v40  ;;  %v289_v50 = vsel %vm272_vm0, %v251_v38, 0  ;;  %v292_v51 = vsel %vm272_vm0, %v252_v39, 0  ;;  %v295_v52 = vsel %vm272_vm0, %v253_v44, 0  ;;  %v258_v32 = vld [vmem:[%s4193_s17 + $0x60] sm:$0xff] }
  0x1e   : > { %3380 = vmatpush3.msra.mxu1 %v559_v29  ;;  %v387_v53 = vand.u32 4294901760, %v4222_v45  ;;  %3408 = vmatprep.subr.mxu0 %v4150_v10  ;;  %v4240_v54 = vsub.f32 %v280_v41, %v4224_v46  ;;  %v4243_v55 = vsub.f32 %v283_v42, %v4226_v47  ;;  %v4246_v56 = vsub.f32 %v286_v43, %v4228_v48 }
  0x1f   : > { %3381 = vmatprep.subr.mxu1 %v566_v30  ;;  %v397_v57 = vand.u32 4294901760, %v4232_v49  ;;  %v4249_v58 = vand.u32 4294901760, %v289_v50  ;;  %v4251_v59 = vand.u32 4294901760, %v292_v51  ;;  %v4253_v60 = vand.u32 4294901760, %v295_v52 }
  0x20   : > { %3382 = vmatpush3.msra.mxu1 %v566_v30  ;;  %v388_v61 = vsub.f32 %v4222_v45, %v387_v53  ;;  %v407_v62 = vand.u32 4294901760, %v4240_v54  ;;  %v417_v63 = vand.u32 4294901760, %v4243_v55  ;;  %v427_v0 = vand.u32 4294901760, %v4246_v56 }
  0x21   : > { %3383 = vmatprep.subr.mxu1 %v573_v34  ;;  %v398_v1 = vsub.f32 %v4232_v49, %v397_v57  ;;  %v4265_v2 = vsub.f32 %v289_v50, %v4249_v58  ;;  %v4268_v6 = vsub.f32 %v292_v51, %v4251_v59  ;;  %v4271_v7 = vsub.f32 %v295_v52, %v4253_v60  ;;  %v259_v51 = vld [vmem:[%s4193_s17 + $0x68] sm:$0xff] }
  0x22   : > { %3384 = vmatpush3.msra.mxu1 %v573_v34  ;;  %v389_v21 = vand.u32 4294901760, %v388_v61  ;;  %v408_v22 = vsub.f32 %v4240_v54, %v407_v62  ;;  %v418_v23 = vsub.f32 %v4243_v55, %v417_v63  ;;  %v428_v24 = vsub.f32 %v4246_v56, %v427_v0 }
  0x23   : > { %3385 = vmatprep.subr.mxu1 %v580_v35  ;;  %v399_v27 = vand.u32 4294901760, %v398_v1  ;;  %v437_v28 = vand.u32 4294901760, %v4265_v2  ;;  %v447_v29 = vand.u32 4294901760, %v4268_v6  ;;  %v457_v30 = vand.u32 4294901760, %v4271_v7 }
  0x24   : > { %3356 = vmatprep.mubr.f32.mxu0 %v389_v21  ;;  %3386 = vmatpush3.msra.mxu1 %v580_v35  ;;  %v409_v33 = vand.u32 4294901760, %v408_v22  ;;  %v419_v34 = vand.u32 4294901760, %v418_v23  ;;  %v298_v37 = vsel %vm272_vm0, %v254_v20, 0  ;;  %v429_v38 = vand.u32 4294901760, %v428_v24 }
  0x25   : > { %3357 = vmatmul.mubr.f32.vlgmr.msra.gmra.mxu0 %v399_v27  ;;  %3388 = vmatmul.mubr.f32.vlgmr.msra.gmra.mxu1 %v4214_v40  ;;  %v438_v39 = vsub.f32 %v4265_v2, %v437_v28  ;;  %v448_v41 = vsub.f32 %v4268_v6, %v447_v29  ;;  %v4298_v42 = vand.u32 4294901760, %v298_v37  ;;  %v301_v35 = vsel %vm272_vm0, %v255_v25, 0 }
  0x26   : > { %3409 = vmatpush3.msra.mxu0 %v4150_v10  ;;  %3439 = vmatprep.subr.mxu1 %v4131_v3  ;;  %v304_v43 = vsel %vm272_vm0, %v256_v26, 0  ;;  %v307_v44 = vsel %vm272_vm0, %v257_v31, 0  ;;  %v310_v50 = vsel %vm272_vm0, %v258_v32, 0  ;;  %v458_v52 = vsub.f32 %v4271_v7, %v457_v30 }
  0x27   : > { %3440 = vmatpush3.msra.mxu1 %v4131_v3  ;;  %3359 = vmatprep.mubr.f32.mxu0 %v409_v33  ;;  %v4312_v10 = vsub.f32 %v298_v37, %v4298_v42  ;;  %v4316_v61 = vand.u32 4294901760, %v301_v35  ;;  %v4318_v1 = vand.u32 4294901760, %v304_v43  ;;  %v4320_v20 = vand.u32 4294901760, %v307_v44 }
  0x28   : > { %3390 = vmatprep.mubr.f32.mxu1 %v4224_v46  ;;  %3410 = vmatprep.subr.mxu0 %v4153_v11  ;;  %v4322_v21 = vand.u32 4294901760, %v310_v50  ;;  %v439_v22 = vand.u32 4294901760, %v438_v39  ;;  %v449_v23 = vand.u32 4294901760, %v448_v41  ;;  %v313_v25 = vsel %vm272_vm0, %v259_v51, 0 }
  0x29   : > { %3360 = vmatmul.mubr.f32.gmra.mxu0 %v419_v34  ;;  %3391 = vmatmul.mubr.f32.gmra.mxu1 %v4226_v47  ;;  %v467_v24 = vand.u32 4294901760, %v4312_v10  ;;  %v4329_v26 = vsub.f32 %v301_v35, %v4316_v61  ;;  %v4332_v27 = vsub.f32 %v304_v43, %v4318_v1  ;;  %v4335_v31 = vsub.f32 %v307_v44, %v4320_v20 }
  0x2a   : > { %3411 = vmatpush3.msra.mxu0 %v4153_v11  ;;  %3362 = vmatprep.mubr.f32.mxu0 %v429_v38  ;;  %v4337_v32 = vand.u32 4294901760, %v313_v25  ;;  %v4345_v33 = vsub.f32 %v310_v50, %v4322_v21  ;;  %v459_v38 = vand.u32 4294901760, %v458_v52 }
  0x2b   : > { %3393 = vmatprep.mubr.f32.mxu1 %v4228_v48  ;;  %3441 = vmatprep.subr.mxu1 %v4133_v4  ;;  %v468_v11 = vsub.f32 %v4312_v10, %v467_v24  ;;  %v477_v34 = vand.u32 4294901760, %v4329_v26  ;;  %v487_v37 = vand.u32 4294901760, %v4332_v27  ;;  %v497_v39 = vand.u32 4294901760, %v4335_v31 }
  0x2c   : > { %3442 = vmatpush3.msra.mxu1 %v4133_v4  ;;  %3412 = vmatprep.subr.mxu0 %v4156_v12  ;;  %v4354_v41 = vsub.f32 %v313_v25, %v4337_v32  ;;  %v507_v50 = vand.u32 4294901760, %v4345_v33 }
  0x2d   : > { %3363 = vmatmul.mubr.f32.gmra.mxu0 %v439_v22  ;;  %3394 = vmatmul.mubr.f32.gmra.mxu1 %v4249_v58  ;;  %v469_v35 = vand.u32 4294901760, %v468_v11  ;;  %v478_v43 = vsub.f32 %v4329_v26, %v477_v34  ;;  %v488_v44 = vsub.f32 %v4332_v27, %v487_v37  ;;  %v498_v52 = vsub.f32 %v4335_v31, %v497_v39 }
  0x2e   : > { %3365 = vmatprep.mubr.f32.mxu0 %v449_v23  ;;  %3396 = vmatprep.mubr.f32.mxu1 %v4251_v59  ;;  %v517_v22 = vand.u32 4294901760, %v4354_v41  ;;  %v508_v23 = vsub.f32 %v4345_v33, %v507_v50 }
  0x2f   : > { %3413 = vmatpush3.msra.mxu0 %v4156_v12  ;;  %3443 = vmatprep.subr.mxu1 %v4135_v5  ;;  %v479_v51 = vand.u32 4294901760, %v478_v43  ;;  %v489_v12 = vand.u32 4294901760, %v488_v44  ;;  %v499_v25 = vand.u32 4294901760, %v498_v52  ;;  %v1390_v52 = vld [vmem:[%s5389_s3 + $0x20] sm:$0xff] }
  0x30   : > { %3444 = vmatpush3.msra.mxu1 %v4135_v5  ;;  %3414 = vmatprep.subr.mxu0 %v4160_v13  ;;  %v518_v11 = vsub.f32 %v4354_v41, %v517_v22 }
  0x31   : > { %3366 = vmatmul.mubr.f32.gmra.mxu0 %v459_v38  ;;  %3397 = vmatmul.mubr.f32.gmra.mxu1 %v4253_v60  ;;  %v509_v38 = vand.u32 4294901760, %v508_v23 }
  0x32   : > { %3368 = vmatprep.mubr.f32.mxu0 %v469_v35  ;;  %3399 = vmatprep.mubr.f32.mxu1 %v4298_v42 }
  0x33   : > { %3415 = vmatpush3.msra.mxu0 %v4160_v13  ;;  %3445 = vmatprep.subr.mxu1 %v4143_v8  ;;  %v519_v13 = vand.u32 4294901760, %v518_v11 }
  0x34   : > { %3446 = vmatpush3.msra.mxu1 %v4143_v8  ;;  %3416 = vmatprep.subr.mxu0 %v4163_v14 }
  0x35   : > { %3369 = vmatmul.mubr.f32.gmra.mxu0 %v479_v51  ;;  %3400 = vmatmul.mubr.f32.gmra.mxu1 %v4316_v61 }
  0x36   : > { %3371 = vmatprep.mubr.f32.mxu0 %v489_v12  ;;  %3402 = vmatprep.mubr.f32.mxu1 %v4318_v1 }
  0x37   : > { %3417 = vmatpush3.msra.mxu0 %v4163_v14  ;;  %3447 = vmatprep.subr.mxu1 %v4145_v9  ;;  %v1399_v14 = vld [vmem:[%s5389_s3 + $0x68] sm:$0xff] }
  0x38   : > { %3448 = vmatpush3.msra.mxu1 %v4145_v9  ;;  %3470 = vmatprep.subr.mxu0 %v4167_v15 }
  0x39   : > { %3372 = vmatmul.mubr.f32.gmra.mxu0 %v499_v25  ;;  %3403 = vmatmul.mubr.f32.gmra.mxu1 %v4320_v20  ;;  %v4637_v25 = vand.u32 4294901760, %v1390_v52 }
  0x3a   : > { %3374 = vmatprep.mubr.f32.mxu0 %v509_v38  ;;  %3405 = vmatprep.mubr.f32.mxu1 %v4322_v21  ;;  %v1389_v38 = vld [vmem:[%s5389_s3 + $0x18] sm:$0xff] }
  0x3b   : > { %3501 = vmatprep.subr.mxu1 %v4131_v3  ;;  %5520 = vst [vmem:[#allocation34_spill] sm:$0xff] %v4637_v25 }
  0x3d   : > { %3375 = vmatmul.mubr.f32.gmra.mxu0 %v519_v13  ;;  %3406 = vmatmul.mubr.f32.gmra.mxu1 %v4337_v32 }
  0x3e   : > { %3418 = vmatprep.mubr.f32.mxu0 %v4222_v45  ;;  %3449 = vmatprep.mubr.f32.mxu1 %v387_v53 }
  0x41   : > { %3419 = vmatmul.mubr.f32.vlgmr.msra.gmra.mxu0 %v4232_v49  ;;  %3450 = vmatmul.mubr.f32.vlgmr.msra.gmra.mxu1 %v397_v57 }
  0x42   : > { %3471 = vmatpush3.msra.mxu0 %v4167_v15  ;;  %3502 = vmatpush3.msra.mxu1 %v4131_v3  ;;  %v1401_v3 = vld [vmem:[%s5389_s3 + $0x78] sm:$0xff] }
  0x43   : > { %3421 = vmatprep.mubr.f32.mxu0 %v4240_v54  ;;  %3452 = vmatprep.mubr.f32.mxu1 %v407_v62  ;;  %v1395_v62 = vld [vmem:[%s5389_s3 + $0x48] sm:$0xff] }
  0x44   : > { %3472 = vmatprep.subr.mxu0 %v4171_v16  ;;  %3503 = vmatprep.subr.mxu1 %v4133_v4 }
  0x45   : > { %3422 = vmatmul.mubr.f32.gmra.mxu0 %v4243_v55  ;;  %3453 = vmatmul.mubr.f32.gmra.mxu1 %v417_v63  ;;  %v1396_v55 = vld [vmem:[%s5389_s3 + $0x50] sm:$0xff] }
  0x46   : > { %3473 = vmatpush3.msra.mxu0 %v4171_v16  ;;  %3424 = vmatprep.mubr.f32.mxu0 %v4246_v56 }
  0x47   : > { %3455 = vmatprep.mubr.f32.mxu1 %v427_v0  ;;  %3504 = vmatpush3.msra.mxu1 %v4133_v4  ;;  %v4485_v4 = vand.u32 4294901760, %v1401_v3 }
  0x48   : > { %3474 = vmatprep.subr.mxu0 %v4174_v17  ;;  %3505 = vmatprep.subr.mxu1 %v4135_v5 }
  0x49   : > { %3425 = vmatmul.mubr.f32.gmra.mxu0 %v4265_v2  ;;  %3456 = vmatmul.mubr.f32.gmra.mxu1 %v437_v28  ;;  %5489 = vst [vmem:[#allocation3_spill] sm:$0xff] %v4485_v4  ;;  %v1394_v28 = vld [vmem:[%s5389_s3 + $0x40] sm:$0xff] }
  0x4a   : > { %3427 = vmatprep.mubr.f32.mxu0 %v4268_v6  ;;  %3458 = vmatprep.mubr.f32.mxu1 %v447_v29  ;;  %v4562_v6 = vand.u32 4294901760, %v1395_v62 }
  0x4b   : > { %3475 = vmatpush3.msra.mxu0 %v4174_v17  ;;  %3506 = vmatpush3.msra.mxu1 %v4135_v5  ;;  %v1400_v5 = vld [vmem:[%s5389_s3 + $0x70] sm:$0xff]  ;;  %v4506_v17 = vand.u32 4294901760, %v1399_v14 }
  0x4c   : > { %3476 = vmatprep.subr.mxu0 %v4178_v18  ;;  %3507 = vmatprep.subr.mxu1 %v4143_v8  ;;  %5505 = vst [vmem:[#allocation19_spill] sm:$0xff] %v4562_v6 }
  0x4d   : > { %3428 = vmatmul.mubr.f32.gmra.mxu0 %v4271_v7  ;;  %3459 = vmatmul.mubr.f32.gmra.mxu1 %v457_v30  ;;  %5494 = vst [vmem:[#allocation8_spill] sm:$0xff] %v4506_v17 }
  0x4e   : > { %3430 = vmatprep.mubr.f32.mxu0 %v4312_v10  ;;  %3461 = vmatprep.mubr.f32.mxu1 %v467_v24  ;;  %v4578_v10 = vand.u32 4294901760, %v1394_v28 }
  0x4f   : > { %3477 = vmatpush3.msra.mxu0 %v4178_v18  ;;  %3508 = vmatpush3.msra.mxu1 %v4143_v8  ;;  %v4491_v8 = vsub.f32 %v1401_v3, %v4485_v4  ;;  %v1398_v18 = vld [vmem:[%s5389_s3 + $0x60] sm:$0xff] }
  0x50   : > { %3478 = vmatprep.subr.mxu0 %v4181_v19  ;;  %3509 = vmatprep.subr.mxu1 %v4145_v9  ;;  %v4521_v45 = vand.u32 4294901760, %v1398_v18  ;;  %5509 = vst [vmem:[#allocation23_spill] sm:$0xff] %v4578_v10  ;;  %v4593_v24 = vsub.f32 %v1394_v28, %v4578_v10 }
  0x51   : > { %3431 = vmatmul.mubr.f32.gmra.mxu0 %v4329_v26  ;;  %3462 = vmatmul.mubr.f32.gmra.mxu1 %v477_v34  ;;  %5490 = vst [vmem:[#allocation4_spill] sm:$0xff] %v4491_v8  ;;  %v4501_v15 = vand.u32 4294901760, %v4491_v8 }
  0x52   : > { %3433 = vmatprep.mubr.f32.mxu0 %v4332_v27  ;;  %3464 = vmatprep.mubr.f32.mxu1 %v487_v37  ;;  %5497 = vst [vmem:[#allocation11_spill] sm:$0xff] %v4521_v45  ;;  %v4534_v53 = vsub.f32 %v1398_v18, %v4521_v45  ;;  %5511 = vst [vmem:[#allocation25_spill] sm:$0xff] %v4593_v24  ;;  %v4605_v34 = vand.u32 4294901760, %v4593_v24 }
  0x53   : > { %3479 = vmatpush3.msra.mxu0 %v4181_v19  ;;  %3510 = vmatpush3.msra.mxu1 %v4145_v9  ;;  %v4493_v9 = vand.u32 4294901760, %v1400_v5  ;;  %5492 = vst [vmem:[#allocation6_spill] sm:$0xff] %v4501_v15  ;;  %v1634_v19 = vsub.f32 %v4491_v8, %v4501_v15 }
  0x54   : > { %3532 = vmatprep.subr.mxu0 %v4485_v4  ;;  %5499 = vst [vmem:[#allocation13_spill] sm:$0xff] %v4534_v53  ;;  %5513 = vst [vmem:[#allocation27_spill] sm:$0xff] %v4605_v34  ;;  %v1683_v43 = vsub.f32 %v4593_v24, %v4605_v34 }
  0x55   : > { %3434 = vmatmul.mubr.f32.gmra.mxu0 %v4335_v31  ;;  %3465 = vmatmul.mubr.f32.gmra.mxu1 %v497_v39  ;;  %5491 = vst [vmem:[#allocation5_spill] sm:$0xff] %v4493_v9  ;;  %v4504_v16 = vsub.f32 %v1400_v5, %v4493_v9  ;;  %v1392_v31 = vld [vmem:[%s5389_s3 + $0x30] sm:$0xff]  ;;  %v4651_v5 = vsub.f32 %v1390_v52, %v4637_v25 }
  0x56   : > { %3436 = vmatprep.mubr.f32.mxu0 %v4345_v33  ;;  %3467 = vmatprep.mubr.f32.mxu1 %v507_v50  ;;  %v4611_v39 = vand.u32 4294901760, %v1392_v31 }
  0x57   : > { %5493 = vst [vmem:[#allocation7_spill] sm:$0xff] %v4504_v16  ;;  %5523 = vst [vmem:[#allocation37_spill] sm:$0xff] %v4651_v5 }
  0x58   : > { %5515 = vst [vmem:[#allocation29_spill] sm:$0xff] %v4611_v39  ;;  %v4626_v51 = vsub.f32 %v1392_v31, %v4611_v39 }
  0x59   : > { %3437 = vmatmul.mubr.f32.gmra.mxu0 %v4354_v41  ;;  %3468 = vmatmul.mubr.f32.gmra.mxu1 %v517_v22  ;;  %v1391_v41 = vld [vmem:[%s5389_s3 + $0x28] sm:$0xff]  ;;  %v1684_v22 = vand.u32 4294901760, %v1683_v43 }
  0x5a   : > { %3480 = vmatprep.mubr.f32.mxu0 %v4208_v36  ;;  %3511 = vmatprep.mubr.f32.mxu1 %v4208_v36  ;;  %v4516_v36 = vand.u32 4294901760, %v4504_v16  ;;  %v4622_v50 = vand.u32 4294901760, %v1391_v41  ;;  %5518 = vst [vmem:[#allocation32_spill] sm:$0xff] %v4626_v51  ;;  %v4641_v11 = vand.u32 4294901760, %v4626_v51 }
  0x5c   : > { %5495 = vst [vmem:[#allocation9_spill] sm:$0xff] %v4516_v36  ;;  %5517 = vst [vmem:[#allocation31_spill] sm:$0xff] %v4622_v50  ;;  %v4635_v23 = vsub.f32 %v1391_v41, %v4622_v50  ;;  %v1697_v18 = vsub.f32 %v4626_v51, %v4641_v11 }
  0x5d   : > { %3481 = vmatmul.mubr.f32.vlgmr.msra.gmra.mxu0 %v4214_v40  ;;  %3512 = vmatmul.mubr.f32.vlgmr.msra.gmra.mxu1 %v4214_v40  ;;  %v4519_v40 = vsub.f32 %v1399_v14, %v4506_v17  ;;  %5521 = vst [vmem:[#allocation35_spill] sm:$0xff] %v4641_v11  ;;  %v4653_v14 = vand.u32 4294901760, %v1389_v38 }
  0x5e   : > { %3483 = vmatprep.mubr.f32.mxu0 %v4224_v46  ;;  %3514 = vmatprep.mubr.f32.mxu1 %v4224_v46  ;;  %v1397_v46 = vld [vmem:[%s5389_s3 + $0x58] sm:$0xff]  ;;  %5519 = vst [vmem:[#allocation33_spill] sm:$0xff] %v4635_v23  ;;  %v4648_v3 = vand.u32 4294901760, %v4635_v23 }
  0x5f   : > { %3533 = vmatpush3.msra.mxu0 %v4485_v4  ;;  %5496 = vst [vmem:[#allocation10_spill] sm:$0xff] %v4519_v40  ;;  %v4531_v49 = vand.u32 4294901760, %v4519_v40  ;;  %v4537_v54 = vand.u32 4294901760, %v1397_v46  ;;  %5524 = vst [vmem:[#allocation38_spill] sm:$0xff] %v4653_v14 }
  0x60   : > { %3534 = vmatprep.subr.mxu0 %v4493_v9  ;;  %5522 = vst [vmem:[#allocation36_spill] sm:$0xff] %v4648_v3 }
  0x61   : > { %3484 = vmatmul.mubr.f32.gmra.mxu0 %v4226_v47  ;;  %3515 = vmatmul.mubr.f32.gmra.mxu1 %v4226_v47  ;;  %v1635_v47 = vand.u32 4294901760, %v1634_v19  ;;  %5498 = vst [vmem:[#allocation12_spill] sm:$0xff] %v4531_v49  ;;  %5500 = vst [vmem:[#allocation14_spill] sm:$0xff] %v4537_v54  ;;  %v1648_v57 = vsub.f32 %v4519_v40, %v4531_v49  ;;  %v1388_v19 = vld [vmem:[%s5389_s3 + $0x10] sm:$0xff] }
  0x62   : > { %3486 = vmatprep.mubr.f32.mxu0 %v4228_v48  ;;  %3517 = vmatprep.mubr.f32.mxu1 %v4228_v48  ;;  %v1641_v48 = vsub.f32 %v4504_v16, %v4516_v36 }
  0x63   : > { %3535 = vmatpush3.msra.mxu0 %v4493_v9  ;;  %3585 = vmatprep.subr.mxu1 %v1635_v47  ;;  %v1649_v63 = vand.u32 4294901760, %v1648_v57  ;;  %v1387_v57 = vld [vmem:[%s5389_s3 + $0x8] sm:$0xff] }
  0x64   : > { %3536 = vmatprep.subr.mxu0 %v4506_v17  ;;  %v1642_v56 = vand.u32 4294901760, %v1641_v48  ;;  %3586 = vmatpush3.msra.mxu1 %v1635_v47  ;;  %v4665_v47 = vand.u32 4294901760, %v4651_v5  ;;  %v4668_v48 = vsub.f32 %v1389_v38, %v4653_v14 }
  0x65   : > { %3487 = vmatmul.mubr.f32.gmra.mxu0 %v4249_v58  ;;  %3518 = vmatmul.mubr.f32.gmra.mxu1 %v4249_v58  ;;  %v4546_v58 = vand.u32 4294901760, %v4534_v53 }
  0x66   : > { %3489 = vmatprep.mubr.f32.mxu0 %v4251_v59  ;;  %3520 = vmatprep.mubr.f32.mxu1 %v4251_v59  ;;  %v4548_v59 = vand.u32 4294901760, %v1396_v55  ;;  %5525 = vst [vmem:[#allocation39_spill] sm:$0xff] %v4665_v47  ;;  %5526 = vst [vmem:[#allocation40_spill] sm:$0xff] %v4668_v48 }
  0x67   : > { %3537 = vmatpush3.msra.mxu0 %v4506_v17  ;;  %5501 = vst [vmem:[#allocation15_spill] sm:$0xff] %v4546_v58  ;;  %3587 = vmatprep.subr.mxu1 %v1642_v56  ;;  %v1655_v0 = vsub.f32 %v4534_v53, %v4546_v58 }
  0x68   : > { %3538 = vmatprep.subr.mxu0 %v4521_v45  ;;  %5502 = vst [vmem:[#allocation16_spill] sm:$0xff] %v4548_v59  ;;  %v4560_v2 = vsub.f32 %v1396_v55, %v4548_v59  ;;  %3588 = vmatpush3.msra.mxu1 %v1642_v56  ;;  %v4670_v55 = vand.u32 4294901760, %v1388_v19  ;;  %v1698_v56 = vand.u32 4294901760, %v1697_v18 }
  0x69   : > { %3490 = vmatmul.mubr.f32.gmra.mxu0 %v4253_v60  ;;  %3521 = vmatmul.mubr.f32.gmra.mxu1 %v4253_v60  ;;  %v4551_v60 = vsub.f32 %v1397_v46, %v4537_v54  ;;  %v1656_v29 = vand.u32 4294901760, %v1655_v0  ;;  %v1704_v46 = vsub.f32 %v4635_v23, %v4648_v3  ;;  %v4680_v0 = vand.u32 4294901760, %v4668_v48 }
  0x6a   : > { %3492 = vmatprep.mubr.f32.mxu0 %v4298_v42  ;;  %3523 = vmatprep.mubr.f32.mxu1 %v4298_v42  ;;  %5504 = vst [vmem:[#allocation18_spill] sm:$0xff] %v4560_v2  ;;  %v4573_v30 = vand.u32 4294901760, %v4560_v2  ;;  %v4576_v42 = vsub.f32 %v1395_v62, %v4562_v6  ;;  %5527 = vst [vmem:[#allocation41_spill] sm:$0xff] %v4670_v55  ;;  %v4683_v28 = vsub.f32 %v1388_v19, %v4670_v55 }
  0x6b   : > { %3539 = vmatpush3.msra.mxu0 %v4521_v45  ;;  %5503 = vst [vmem:[#allocation17_spill] sm:$0xff] %v4551_v60  ;;  %v4566_v7 = vand.u32 4294901760, %v4551_v60  ;;  %3589 = vmatprep.subr.mxu1 %v1649_v63  ;;  %v1705_v62 = vand.u32 4294901760, %v1704_v46  ;;  %5528 = vst [vmem:[#allocation42_spill] sm:$0xff] %v4680_v0 }
  0x6c   : > { %3540 = vmatprep.subr.mxu0 %v4537_v54  ;;  %5507 = vst [vmem:[#allocation21_spill] sm:$0xff] %v4573_v30  ;;  %5508 = vst [vmem:[#allocation22_spill] sm:$0xff] %v4576_v42  ;;  %3590 = vmatpush3.msra.mxu1 %v1649_v63  ;;  %v1711_v63 = vsub.f32 %v4651_v5, %v4665_v47 }
  0x6d   : > { %3493 = vmatmul.mubr.f32.gmra.mxu0 %v4316_v61  ;;  %3524 = vmatmul.mubr.f32.gmra.mxu1 %v4316_v61  ;;  %5506 = vst [vmem:[#allocation20_spill] sm:$0xff] %v4566_v7  ;;  %v1662_v61 = vsub.f32 %v4551_v60, %v4566_v7  ;;  %5529 = vst [vmem:[#allocation43_spill] sm:$0xff] %v4683_v28 }
  0x6e   : > { %3495 = vmatprep.mubr.f32.mxu0 %v4318_v1  ;;  %3526 = vmatprep.mubr.f32.mxu1 %v4318_v1  ;;  %v1393_v1 = vld [vmem:[%s5389_s3 + $0x38] sm:$0xff] }
  0x6f   : > { %3541 = vmatpush3.msra.mxu0 %v4537_v54  ;;  %3591 = vmatprep.subr.mxu1 %v1656_v29  ;;  %v4595_v26 = vand.u32 4294901760, %v1393_v1  ;;  %v1663_v27 = vand.u32 4294901760, %v1662_v61  ;;  %v1712_v61 = vand.u32 4294901760, %v1711_v63 }
  0x70   : > { %3542 = vmatprep.subr.mxu0 %v4548_v59  ;;  %3592 = vmatpush3.msra.mxu1 %v1656_v29  ;;  %v4686_v29 = vand.u32 4294901760, %v1387_v57 }
  0x71   : > { %3496 = vmatmul.mubr.f32.gmra.mxu0 %v4320_v20  ;;  %3527 = vmatmul.mubr.f32.gmra.mxu1 %v4320_v20  ;;  %v1669_v20 = vsub.f32 %v4560_v2, %v4573_v30  ;;  %5512 = vst [vmem:[#allocation26_spill] sm:$0xff] %v4595_v26  ;;  %v4608_v37 = vsub.f32 %v1393_v1, %v4595_v26 }
  0x72   : > { %3498 = vmatprep.mubr.f32.mxu0 %v4322_v21  ;;  %3529 = vmatprep.mubr.f32.mxu1 %v4322_v21  ;;  %v4590_v21 = vand.u32 4294901760, %v4576_v42  ;;  %5530 = vst [vmem:[#allocation44_spill] sm:$0xff] %v4686_v29  ;;  %v1718_v1 = vsub.f32 %v4668_v48, %v4680_v0  ;;  %v4699_v31 = vsub.f32 %v1387_v57, %v4686_v29 }
  0x73   : > { %3543 = vmatpush3.msra.mxu0 %v4548_v59  ;;  %5514 = vst [vmem:[#allocation28_spill] sm:$0xff] %v4608_v37  ;;  %3593 = vmatprep.subr.mxu1 %v1663_v27  ;;  %v4620_v44 = vand.u32 4294901760, %v4608_v37 }
  0x74   : > { %3544 = vmatprep.subr.mxu0 %v4562_v6  ;;  %5510 = vst [vmem:[#allocation24_spill] sm:$0xff] %v4590_v21  ;;  %v1676_v33 = vsub.f32 %v4576_v42, %v4590_v21  ;;  %3594 = vmatpush3.msra.mxu1 %v1663_v27  ;;  %v1386_v27 = vld [vmem:[%s5389_s3] sm:$0xff]  ;;  %5532 = vst [vmem:[#allocation46_spill] sm:$0xff] %v4699_v31 }
  0x75   : > { %3499 = vmatmul.mubr.f32.gmra.mxu0 %v4337_v32  ;;  %3530 = vmatmul.mubr.f32.gmra.mxu1 %v4337_v32  ;;  %v1670_v32 = vand.u32 4294901760, %v1669_v20  ;;  %5516 = vst [vmem:[#allocation30_spill] sm:$0xff] %v4620_v44  ;;  %v1690_v12 = vsub.f32 %v4608_v37, %v4620_v44  ;;  %v4692_v20 = vand.u32 4294901760, %v4683_v28 }
  0x76   : > { %3545 = vmatpush3.msra.mxu0 %v4562_v6  ;;  %v1677_v35 = vand.u32 4294901760, %v1676_v33  ;;  %v1719_v33 = vand.u32 4294901760, %v1718_v1 }
  0x77   : > { %3546 = vmatprep.subr.mxu0 %v4578_v10  ;;  %3595 = vmatprep.subr.mxu1 %v1670_v32  ;;  %v1691_v13 = vand.u32 4294901760, %v1690_v12  ;;  %5531 = vst [vmem:[#allocation45_spill] sm:$0xff] %v4692_v20  ;;  %v1725_v41 = vsub.f32 %v4683_v28, %v4692_v20 }
  0x78   : > { %3547 = vmatpush3.msra.mxu0 %v4578_v10  ;;  %3596 = vmatpush3.msra.mxu1 %v1670_v32  ;;  %v4701_v32 = vand.u32 4294901760, %v1386_v27 }
  0x79   : > { %3548 = vmatprep.subr.mxu0 %v4595_v26  ;;  %3597 = vmatprep.subr.mxu1 %v1677_v35  ;;  %v1726_v52 = vand.u32 4294901760, %v1725_v41 }
  0x7a   : > { %3549 = vmatpush3.msra.mxu0 %v4595_v26  ;;  %3598 = vmatpush3.msra.mxu1 %v1677_v35  ;;  %5533 = vst [vmem:[#allocation47_spill] sm:$0xff] %v4701_v32  ;;  %v4708_v35 = vand.u32 4294901760, %v4699_v31  ;;  %v4711_v43 = vsub.f32 %v1386_v27, %v4701_v32 }
  0x7b   : > { %3550 = vmatprep.subr.mxu0 %v4611_v39  ;;  %3599 = vmatprep.subr.mxu1 %v1684_v22 }
  0x7c   : > { %3551 = vmatpush3.msra.mxu0 %v4611_v39  ;;  %3600 = vmatpush3.msra.mxu1 %v1684_v22  ;;  %5534 = vst [vmem:[#allocation48_spill] sm:$0xff] %v4708_v35  ;;  %5535 = vst [vmem:[#allocation49_spill] sm:$0xff] %v4711_v43  ;;  %v1732_v22 = vsub.f32 %v4699_v31, %v4708_v35  ;;  %v4718_v12 = vand.u32 4294901760, %v4711_v43 }
  0x7d   : > { %3552 = vmatprep.subr.mxu0 %v4622_v50  ;;  %3601 = vmatprep.subr.mxu1 %v1691_v13 }
  0x7e   : > { %3553 = vmatpush3.msra.mxu0 %v4622_v50  ;;  %3602 = vmatpush3.msra.mxu1 %v1691_v13  ;;  %5536 = vst [vmem:[#allocation50_spill] sm:$0xff] %v4718_v12  ;;  %v1733_v38 = vand.u32 4294901760, %v1732_v22  ;;  %v1739_v13 = vsub.f32 %v4711_v43, %v4718_v12 }
  0x7f   : > { %3554 = vmatprep.subr.mxu0 %v4637_v25  ;;  %3603 = vmatprep.subr.mxu1 %v1698_v56 }
  0x80   : > { %3555 = vmatpush3.msra.mxu0 %v4637_v25  ;;  %3604 = vmatpush3.msra.mxu1 %v1698_v56  ;;  %v1740_v18 = vand.u32 4294901760, %v1739_v13 }
  0x81   : > { %3556 = vmatprep.subr.mxu0 %v4653_v14  ;;  %3605 = vmatprep.subr.mxu1 %v1705_v62 }
  0x82   : > { %3557 = vmatpush3.msra.mxu0 %v4653_v14  ;;  %3606 = vmatpush3.msra.mxu1 %v1705_v62  ;;  %v2968_v14 = vld [vmem:[%s5388_s2] ss:$0 sm:$0xff] }
  0x83   : > { %3558 = vmatprep.subr.mxu0 %v4670_v55  ;;  %3607 = vmatprep.subr.mxu1 %v1712_v61 }
  0x84   : > { %3559 = vmatpush3.msra.mxu0 %v4670_v55  ;;  %3608 = vmatpush3.msra.mxu1 %v1712_v61 }
  0x85   : > { %3560 = vmatprep.subr.mxu0 %v4686_v29  ;;  %3609 = vmatprep.subr.mxu1 %v1719_v33 }
  0x86   : > { %3561 = vmatpush3.msra.mxu0 %v4686_v29  ;;  %3610 = vmatpush3.msra.mxu1 %v1719_v33 }
  0x87   : > { %3562 = vmatprep.subr.mxu0 %v4701_v32  ;;  %3611 = vmatprep.subr.mxu1 %v1726_v52 }
  0x88   : > { %3563 = vmatpush3.msra.mxu0 %v4701_v32  ;;  %3612 = vmatpush3.msra.mxu1 %v1726_v52 }
  0x89   : > { %3638 = vmatprep.subr.mxu0 %v4491_v8  ;;  %3613 = vmatprep.subr.mxu1 %v1733_v38 }
  0x8a   : > { %3614 = vmatpush3.msra.mxu1 %v1733_v38 }
  0x8b   : > { %3615 = vmatprep.subr.mxu1 %v1740_v18 }
  0x8c   : > { %3616 = vmatpush3.msra.mxu1 %v1740_v18 }
  0x8d   : > { %3691 = vmatprep.subr.mxu1 %v4485_v4 }
  0xe5   : > { %v3358_v19 = vpop.f32.mrf.mxu0  ;;  %v3389_v46 = vpop.f32.mrf.mxu1 }
  0xe6   : > { %v402_v42 = vadd.f32 %v3358_v19, %v2968_v14 }
  0xe7   : > { %v391_v56 = vpop.f32.mrf.mxu0  ;;  %v617_v57 = vpop.f32.mrf.mxu1 }
  0xe8   : > { %v392_v26 = vadd.f32 %v2968_v14, %v391_v56  ;;  %v624_v53 = vadd.f32 %v3389_v46, %v402_v42 }
  0xe9   : > { %v3361_v62 = vpop.f32.mrf.mxu0  ;;  %v3392_v63 = vpop.f32.mrf.mxu1 }
  0xea   : > { %v422_v6 = vadd.f32 %v3361_v62, %v2968_v14  ;;  %v618_v8 = vadd.f32 %v617_v57, %v392_v26 }
  0xeb   : > { %v411_v61 = vpop.f32.mrf.mxu0  ;;  %v629_v1 = vpop.f32.mrf.mxu1 }
  0xec   : > { %v412_v40 = vadd.f32 %v2968_v14, %v411_v61  ;;  %v636_v56 = vadd.f32 %v3392_v63, %v422_v6 }
  0xed   : > { %v3364_v27 = vpop.f32.mrf.mxu0  ;;  %v4724_v33 = vpop.f32.mrf.mxu1 }
  0xee   : > { %v442_v54 = vadd.f32 %v3364_v27, %v2968_v14 }
  0xef   : > { %v431_v41 = vpop.f32.mrf.mxu0  ;;  %v4726_v52 = vpop.f32.mrf.mxu1 }
  0xf0   : > { %v432_v19 = vadd.f32 %v2968_v14, %v431_v41  ;;  %v648_v26 = vadd.f32 %v4724_v33, %v442_v54 }
  0xf1   : > { %v3367_v22 = vpop.f32.mrf.mxu0  ;;  %v4728_v38 = vpop.f32.mrf.mxu1 }
  0xf2   : > { %v462_v4 = vadd.f32 %v3367_v22, %v2968_v14  ;;  %v642_v27 = vadd.f32 %v4726_v52, %v432_v19 }
  0xf3   : > { %v451_v13 = vpop.f32.mrf.mxu0  ;;  %v4730_v18 = vpop.f32.mrf.mxu1 }
  0xf5   : > { %v3370_v12 = vpop.f32.mrf.mxu0  ;;  %v4732_v35 = vpop.f32.mrf.mxu1 }
  0xf6   : > { %v482_v42 = vadd.f32 %v3370_v12, %v2968_v14 }
  0xf7   : > { %v471_v20 = vpop.f32.mrf.mxu0  ;;  %v4734_v0 = vpop.f32.mrf.mxu1 }
  0xf8   : > { %v472_v46 = vadd.f32 %v2968_v14, %v471_v20  ;;  %v672_v22 = vadd.f32 %v4732_v35, %v482_v42 }
  0xf9   : > { %v3373_v47 = vpop.f32.mrf.mxu0  ;;  %v4736_v3 = vpop.f32.mrf.mxu1 }
  0xfa   : > { %v502_v57 = vadd.f32 %v3373_v47, %v2968_v14  ;;  %v666_v54 = vadd.f32 %v4734_v0, %v472_v46 }
  0xfb   : > { %v491_v11 = vpop.f32.mrf.mxu0  ;;  %v4738_v44 = vpop.f32.mrf.mxu1 }
  0xfc   : > { %v492_v41 = vadd.f32 %v2968_v14, %v491_v11  ;;  %v684_v11 = vadd.f32 %v4736_v3, %v502_v57 }
  0xfd   : > { %v3376_v34 = vpop.f32.mrf.mxu0  ;;  %v4740_v21 = vpop.f32.mrf.mxu1 }
  0xff   : > { %v511_v30 = vpop.f32.mrf.mxu0  ;;  %v4742_v7 = vpop.f32.mrf.mxu1 }
 0x100   : > { %v512_v6 = vadd.f32 %v2968_v14, %v511_v30 }
 0x101   : > { %v3420_v58 = vpop.f32.mrf.mxu0  ;;  %v3451_v49 = vpop.f32.mrf.mxu1 }
 0x102   : > { %v785_v45 = vadd.f32 %v3420_v58, %v624_v53 }
 0x103   : > { %v777_v36 = vpop.f32.mrf.mxu0  ;;  %v946_v15 = vpop.f32.mrf.mxu1 }
 0x104   : > { %v955_v53 = vadd.f32 %v3451_v49, %v785_v45 }
 0x105   : > { %v3423_v43 = vpop.f32.mrf.mxu0  ;;  %v3454_v31 = vpop.f32.mrf.mxu1 }
 0x106   : > { %v799_v58 = vadd.f32 %v3423_v43, %v636_v56  ;;  %v678_v43 = vadd.f32 %v4738_v44, %v492_v41 }
 0x107   : > { %v791_v28 = vpop.f32.mrf.mxu0  ;;  %v4744_v48 = vpop.f32.mrf.mxu1 }
 0x109   : > { %v3426_v32 = vpop.f32.mrf.mxu0  ;;  %v4746_v5 = vpop.f32.mrf.mxu1 }
 0x10a   : > { %v813_v45 = vadd.f32 %v3426_v32, %v648_v26 }
 0x10b   : > { %v805_v29 = vpop.f32.mrf.mxu0  ;;  %v4748_v23 = vpop.f32.mrf.mxu1 }
 0x10c   : > { %v987_v3 = vadd.f32 %v4746_v5, %v813_v45  ;;  %v5544_v45 = vld [vmem:[#allocation3_spill] sm:$0xff] }
 0x10d   : > { %v4750_v55 = vpop.f32.mrf.mxu0  ;;  %v4752_v51 = vpop.f32.mrf.mxu1 }
 0x10f   : > { %v4757_v37 = vpop.f32.mrf.mxu0  ;;  %v4759_v25 = vpop.f32.mrf.mxu1 }
 0x111   : > { %v4761_v24 = vpop.f32.mrf.mxu0  ;;  %v4763_v50 = vpop.f32.mrf.mxu1 }
 0x112   : > { %5537 = vst [vmem:[#allocation51_spill] sm:$0xff] %v4763_v50  ;;  %v630_v50 = vadd.f32 %v629_v1, %v412_v40  ;;  %v841_v44 = vadd.f32 %v4761_v24, %v672_v22 }
 0x113   : > { %v4765_v39 = vpop.f32.mrf.mxu0  ;;  %v4767_v2 = vpop.f32.mrf.mxu1 }
 0x114   : > { %5538 = vst [vmem:[#allocation52_spill] sm:$0xff] %v4767_v2  ;;  %v778_v2 = vadd.f32 %v777_v36, %v618_v8  ;;  %v660_v36 = vadd.f32 %v4728_v38, %v462_v4  ;;  %v792_v20 = vadd.f32 %v791_v28, %v630_v50 }
 0x115   : > { %v4769_v60 = vpop.f32.mrf.mxu0  ;;  %v4771_v10 = vpop.f32.mrf.mxu1 }
 0x116   : > { %5539 = vst [vmem:[#allocation53_spill] sm:$0xff] %v4771_v10  ;;  %v452_v10 = vadd.f32 %v2968_v14, %v451_v13  ;;  %v947_v40 = vadd.f32 %v946_v15, %v778_v2  ;;  %v4795_v15 = vadd.f32 %v4742_v7, %v512_v6  ;;  %v806_v2 = vadd.f32 %v805_v29, %v642_v27 }
 0x117   : > { %v4773_v59 = vpop.f32.mrf.mxu0  ;;  %v4775_v16 = vpop.f32.mrf.mxu1  ;;  %v963_v0 = vadd.f32 %v4744_v48, %v792_v20  ;;  %v834_v13 = vadd.f32 %v4765_v39, %v666_v54 }
 0x118   : > { %v654_v1 = vadd.f32 %v4730_v18, %v452_v10  ;;  %v979_v48 = vadd.f32 %v4748_v23, %v806_v2  ;;  %v855_v18 = vadd.f32 %v4769_v60, %v684_v11  ;;  %v848_v5 = vadd.f32 %v4773_v59, %v678_v43 }
 0x119   : > { %v4777_v17 = vpop.f32.mrf.mxu0  ;;  %v4779_v9 = vpop.f32.mrf.mxu1  ;;  %v5541_v23 = vld [vmem:[#allocation51_spill] sm:$0xff] }
 0x11a   : > { %5540 = vst [vmem:[#allocation54_spill] sm:$0xff] %v4779_v9  ;;  %v522_v9 = vadd.f32 %v3376_v34, %v2968_v14  ;;  %v971_v34 = vadd.f32 %v3454_v31, %v799_v58  ;;  %v827_v31 = vadd.f32 %v4750_v55, %v660_v36  ;;  %v820_v33 = vadd.f32 %v4757_v37, %v654_v1 }
 0x11b   : > { %v4781_v62 = vpop.f32.mrf.mxu0  ;;  %v4783_v61 = vpop.f32.mrf.mxu1  ;;  %v1019_v57 = vadd.f32 %v5541_v23, %v841_v44  ;;  %v5542_v6 = vld [vmem:[#allocation52_spill] sm:$0xff] }
 0x11c   : > { %v696_v4 = vadd.f32 %v4740_v21, %v522_v9  ;;  %v1003_v46 = vadd.f32 %v4752_v51, %v827_v31  ;;  %v995_v26 = vadd.f32 %v4759_v25, %v820_v33 }
 0x11d   : > { %v3482_v63 = vpop.f32.mrf.mxu0  ;;  %v3513_v8 = vpop.f32.mrf.mxu1  ;;  %v5543_v51 = vld [vmem:[#allocation53_spill] sm:$0xff] }
 0x11e   : > { %v1143_v12 = vadd.f32 %v3482_v63, %v955_v53  ;;  %v1011_v63 = vadd.f32 %v5542_v6, %v834_v13  ;;  %v5549_v6 = vld [vmem:[#allocation4_spill] sm:$0xff] }
 0x11f   : > { %v1136_v49 = vpop.f32.mrf.mxu0  ;;  %v1290_v47 = vpop.f32.mrf.mxu1 }
 0x120   : > { %v1297_v30 = vadd.f32 %v3513_v8, %v1143_v12  ;;  %v1137_v14 = vadd.f32 %v1136_v49, %v947_v40  ;;  %v1035_v8 = vadd.f32 %v5543_v51, %v855_v18  ;;  %v4827_v12 = vadd.f32 %v4775_v16, %v848_v5 }
 0x121   : > { %v3485_v10 = vpop.f32.mrf.mxu0  ;;  %v3516_v50 = vpop.f32.mrf.mxu1  ;;  %v4834_v49 = vadd.f32 %v4777_v17, %v696_v4 }
 0x122   : > { %v1373_v28 = vmax.f32 %v1297_v30, 0.0  ;;  %v1291_v32 = vadd.f32 %v1290_v47, %v1137_v14  ;;  %v1155_v35 = vadd.f32 %v3485_v10, %v971_v34  ;;  %v5545_v34 = vld [vmem:[#allocation5_spill] sm:$0xff] }
 0x123   : > { %v1148_v9 = vpop.f32.mrf.mxu0  ;;  %v1302_v21 = vpop.f32.mrf.mxu1 }
 0x124   : > { %v4802_v7 = vand.u32 4294901760, %v1373_v28  ;;  %v1372_v29 = vmax.f32 %v1291_v32, 0.0  ;;  %v1149_v52 = vadd.f32 %v1148_v9, %v963_v0  ;;  %v1309_v38 = vadd.f32 %v3516_v50, %v1155_v35  ;;  %v5546_v0 = vld [vmem:[#allocation8_spill] sm:$0xff] }
 0x125   : > { %v3488_v55 = vpop.f32.mrf.mxu0  ;;  %v3519_v19 = vpop.f32.mrf.mxu1 }
 0x126   : > { %v4809_v37 = vsub.f32 %v1373_v28, %v4802_v7  ;;  %v4811_v24 = vand.u32 4294901760, %v1372_v29  ;;  %v1375_v56 = vmax.f32 %v1309_v38, 0.0  ;;  %v1167_v42 = vadd.f32 %v3488_v55, %v987_v3 }
 0x127   : > { %v1303_v39 = vadd.f32 %v1302_v21, %v1149_v52  ;;  %v1160_v53 = vpop.f32.mrf.mxu0  ;;  %v1314_v60 = vpop.f32.mrf.mxu1  ;;  %v862_v21 = vadd.f32 %v4781_v62, %v4795_v15 }
 0x128   : > { %v1502_v59 = vand.u32 4294901760, %v4809_v37  ;;  %v4818_v58 = vsub.f32 %v1372_v29, %v4811_v24  ;;  %v4820_v27 = vand.u32 4294901760, %v1375_v56  ;;  %v1161_v41 = vadd.f32 %v1160_v53, %v979_v48  ;;  %3617 = vmatprep.mubr.f32.mxu1 %v4811_v24 }
 0x129   : > { %v1374_v25 = vmax.f32 %v1303_v39, 0.0  ;;  %v1321_v36 = vadd.f32 %v3519_v19, %v1167_v42  ;;  %v3491_v40 = vpop.f32.mrf.mxu0  ;;  %3618 = vmatmul.mubr.f32.vlgmr.msra.gmra.mxu1 %v4802_v7  ;;  %v3522_v20 = vpop.f32.mrf.mxu1  ;;  %v5547_v19 = vld [vmem:[#allocation11_spill] sm:$0xff]  ;;  %v5548_v39 = vld [vmem:[#allocation14_spill] sm:$0xff] }
 0x12a   : > { %v4830_v1 = vsub.f32 %v1375_v56, %v4820_v27  ;;  %v1179_v22 = vadd.f32 %v3491_v40, %v1003_v46  ;;  %v1315_v54 = vadd.f32 %v1314_v60, %v1161_v41  ;;  %3692 = vmatpush3.msra.mxu1 %v5544_v45  ;;  %v1492_v16 = vand.u32 4294901760, %v4818_v58 }
 0x12b   : > { %v4836_v47 = vand.u32 4294901760, %v1374_v25  ;;  %v1377_v11 = vmax.f32 %v1321_v36, 0.0  ;;  %3693 = vmatprep.subr.mxu1 %v5545_v34  ;;  %v1172_v30 = vpop.f32.mrf.mxu0  ;;  %v1326_v14 = vpop.f32.mrf.mxu1  ;;  %v1503_v43 = vsub.f32 %v4809_v37, %v1502_v59 }
 0x12c   : > { %v1376_v2 = vmax.f32 %v1315_v54, 0.0  ;;  %v1173_v10 = vadd.f32 %v1172_v30, %v995_v26  ;;  %v4843_v50 = vadd.f32 %v3522_v20, %v1179_v22  ;;  %3694 = vmatpush3.msra.mxu1 %v5545_v34  ;;  %v1493_v35 = vsub.f32 %v4818_v58, %v1492_v16 }
 0x12d   : > { %v4847_v17 = vsub.f32 %v1374_v25, %v4836_v47  ;;  %v4849_v4 = vand.u32 4294901760, %v1377_v11  ;;  %3620 = vmatprep.mubr.f32.mxu1 %v4836_v47  ;;  %3695 = vmatprep.subr.mxu1 %v5546_v0  ;;  %v3494_v28 = vpop.f32.mrf.mxu0  ;;  %v3525_v32 = vpop.f32.mrf.mxu1  ;;  %v1522_v3 = vand.u32 4294901760, %v4830_v1  ;;  %v1504_v18 = vand.u32 4294901760, %v1503_v43  ;;  %v5552_v43 = vld [vmem:[#allocation16_spill] sm:$0xff] }
 0x12e   : > { %v4857_v31 = vand.u32 4294901760, %v1376_v2  ;;  %v1379_v33 = vmax.f32 %v4843_v50, 0.0  ;;  %v1191_v44 = vadd.f32 %v3494_v28, %v1019_v57  ;;  %v1327_v9 = vadd.f32 %v1326_v14, %v1173_v10  ;;  %3621 = vmatmul.mubr.f32.gmra.mxu1 %v4820_v27 }
 0x12f   : > { %v4864_v29 = vsub.f32 %v1377_v11, %v4849_v4  ;;  %3696 = vmatpush3.msra.mxu1 %v5546_v0  ;;  %v1184_v52 = vpop.f32.mrf.mxu0  ;;  %v1494_v38 = vand.u32 4294901760, %v1493_v35  ;;  %v1338_v48 = vpop.f32.mrf.mxu1  ;;  %v1512_v13 = vand.u32 4294901760, %v4847_v17  ;;  %v1523_v26 = vsub.f32 %v4830_v1, %v1522_v3  ;;  %v5551_v11 = vld [vmem:[#allocation54_spill] sm:$0xff] }
 0x130   : > { %v4869_v5 = vsub.f32 %v1376_v2, %v4857_v31  ;;  %v1378_v55 = vmax.f32 %v1327_v9, 0.0  ;;  %3697 = vmatprep.subr.mxu1 %v5547_v19  ;;  %v1185_v56 = vadd.f32 %v1184_v52, %v1011_v63  ;;  %3623 = vmatprep.mubr.f32.mxu1 %v4857_v31  ;;  %v4873_v62 = vadd.f32 %v3525_v32, %v1191_v44  ;;  %v5553_v44 = vld [vmem:[#allocation10_spill] sm:$0xff] }
 0x131   : > { %3698 = vmatpush3.msra.mxu1 %v5547_v19  ;;  %3564 = vmatprep.mubr.f32.mxu0 %v1494_v38  ;;  %v3497_v15 = vpop.f32.mrf.mxu0  ;;  %v3528_v42 = vpop.f32.mrf.mxu1  ;;  %v1513_v46 = vsub.f32 %v4847_v17, %v1512_v13  ;;  %v4882_v23 = vand.u32 4294901760, %v1379_v33  ;;  %v1542_v40 = vand.u32 4294901760, %v4864_v29  ;;  %v1051_v30 = vadd.f32 %v5551_v11, %v4834_v49 }
 0x132   : > { %v4884_v57 = vand.u32 4294901760, %v1378_v55  ;;  %3699 = vmatprep.subr.mxu1 %v5548_v39  ;;  %v1203_v53 = vadd.f32 %v3497_v15, %v1035_v8  ;;  %v1339_v60 = vadd.f32 %v1338_v48, %v1185_v56  ;;  %3565 = vmatmul.mubr.f32.vlgmr.msra.gmra.mxu0 %v1504_v18  ;;  %v1381_v41 = vmax.f32 %v4873_v62, 0.0  ;;  %v5550_v8 = vld [vmem:[#allocation7_spill] sm:$0xff] }
 0x133   : > { %3624 = vmatmul.mubr.f32.gmra.mxu1 %v4849_v4  ;;  %3639 = vmatpush3.msra.mxu0 %v5549_v6  ;;  %v1196_v63 = vpop.f32.mrf.mxu0  ;;  %v1514_v51 = vand.u32 4294901760, %v1513_v46  ;;  %v1350_v25 = vpop.f32.mrf.mxu1  ;;  %v1532_v36 = vand.u32 4294901760, %v4869_v5  ;;  %v1043_v14 = vadd.f32 %v4783_v61, %v862_v21  ;;  %v1524_v10 = vand.u32 4294901760, %v1523_v26  ;;  %v5554_v18 = vld [vmem:[#allocation19_spill] sm:$0xff] }
 0x134   : > { %v4893_v20 = vsub.f32 %v1378_v55, %v4884_v57  ;;  %v1380_v22 = vmax.f32 %v1339_v60, 0.0  ;;  %3700 = vmatpush3.msra.mxu1 %v5548_v39  ;;  %3640 = vmatprep.subr.mxu0 %v5550_v8  ;;  %v1197_v54 = vadd.f32 %v1196_v63, %v4827_v12  ;;  %v4907_v32 = vsub.f32 %v1379_v33, %v4882_v23  ;;  %v5556_v6 = vld [vmem:[#allocation23_spill] sm:$0xff] }
 0x135   : > { %3701 = vmatprep.subr.mxu1 %v5552_v43  ;;  %3641 = vmatpush3.msra.mxu0 %v5550_v8  ;;  %v3500_v2 = vpop.f32.mrf.mxu0  ;;  %v3531_v50 = vpop.f32.mrf.mxu1  ;;  %v1533_v28 = vsub.f32 %v4869_v5, %v1532_v36  ;;  %v1357_v35 = vadd.f32 %v3528_v42, %v1203_v53  ;;  %v4912_v49 = vand.u32 4294901760, %v1381_v41  ;;  %v1543_v33 = vsub.f32 %v4864_v29, %v1542_v40  ;;  %v5555_v42 = vld [vmem:[#allocation13_spill] sm:$0xff] }
 0x136   : > { %v4909_v12 = vand.u32 4294901760, %v1380_v22  ;;  %3702 = vmatpush3.msra.mxu1 %v5552_v43  ;;  %3567 = vmatprep.mubr.f32.mxu0 %v1514_v51  ;;  %v1351_v61 = vadd.f32 %v1350_v25, %v1197_v54  ;;  %v1215_v9 = vadd.f32 %v3500_v2, %v1051_v30  ;;  %v1552_v38 = vand.u32 4294901760, %v4893_v20  ;;  %v5557_v54 = vld [vmem:[#allocation17_spill] sm:$0xff]  ;;  %v5558_v30 = vld [vmem:[#allocation26_spill] sm:$0xff] }
 0x137   : > { %3626 = vmatprep.mubr.f32.mxu1 %v4884_v57  ;;  %3642 = vmatprep.subr.mxu0 %v5553_v44  ;;  %v1208_v21 = vpop.f32.mrf.mxu0  ;;  %v1362_v52 = vpop.f32.mrf.mxu1  ;;  %v1534_v62 = vand.u32 4294901760, %v1533_v28  ;;  %v1383_v15 = vmax.f32 %v1357_v35, 0.0  ;;  %v1562_v53 = vand.u32 4294901760, %v4907_v32  ;;  %v1544_v63 = vand.u32 4294901760, %v1543_v33  ;;  %v5559_v28 = vld [vmem:[#allocation18_spill] sm:$0xff] }
 0x138   : > { %v4921_v48 = vsub.f32 %v1380_v22, %v4909_v12  ;;  %3703 = vmatprep.subr.mxu1 %v5554_v18  ;;  %v1382_v55 = vmax.f32 %v1351_v61, 0.0  ;;  %3568 = vmatmul.mubr.f32.gmra.mxu0 %v1524_v10  ;;  %v1209_v56 = vadd.f32 %v1208_v21, %v1043_v14  ;;  %v1553_v26 = vsub.f32 %v4893_v20, %v1552_v38 }
 0x139   : > { %3627 = vmatmul.mubr.f32.gmra.mxu1 %v4882_v23  ;;  %3643 = vmatpush3.msra.mxu0 %v5553_v44  ;;  %v4937_v51 = vsub.f32 %v1381_v41, %v4912_v49  ;;  %v1369_v25 = vadd.f32 %v3531_v50, %v1215_v9  ;;  %v4943_v11 = vand.u32 4294901760, %v1383_v15  ;;  %v1563_v41 = vsub.f32 %v4907_v32, %v1562_v53  ;;  %v5560_v44 = vld [vmem:[#allocation29_spill] sm:$0xff] }
 0x13a   : > { %3704 = vmatpush3.msra.mxu1 %v5554_v18  ;;  %3644 = vmatprep.subr.mxu0 %v5555_v42  ;;  %v1363_v46 = vadd.f32 %v1362_v52, %v1209_v56  ;;  %v4932_v60 = vand.u32 4294901760, %v1382_v55  ;;  %v1572_v8 = vand.u32 4294901760, %v4921_v48  ;;  %v1554_v14 = vand.u32 4294901760, %v1553_v26  ;;  %v5561_v52 = vld [vmem:[#allocation22_spill] sm:$0xff] }
 0x13b   : > { %3705 = vmatprep.subr.mxu1 %v5556_v6  ;;  %3645 = vmatpush3.msra.mxu0 %v5555_v42  ;;  %v1385_v10 = vmax.f32 %v1369_v25, 0.0  ;;  %v1582_v61 = vand.u32 4294901760, %v4937_v51  ;;  %v4965_v9 = vsub.f32 %v1383_v15, %v4943_v11  ;;  %v1564_v21 = vand.u32 4294901760, %v1563_v41  ;;  %v5565_v41 = vld [vmem:[#allocation28_spill] sm:$0xff] }
 0x13c   : > { %3706 = vmatpush3.msra.mxu1 %v5556_v6  ;;  %3570 = vmatprep.mubr.f32.mxu0 %v1534_v62  ;;  %v1384_v22 = vmax.f32 %v1363_v46, 0.0  ;;  %v4950_v2 = vsub.f32 %v1382_v55, %v4932_v60  ;;  %v1573_v35 = vsub.f32 %v4921_v48, %v1572_v8  ;;  %v5562_v62 = vld [vmem:[#allocation31_spill] sm:$0xff]  ;;  %v5563_v46 = vld [vmem:[#allocation25_spill] sm:$0xff] }
 0x13d   : > { %3629 = vmatprep.mubr.f32.mxu1 %v4909_v12  ;;  %3646 = vmatprep.subr.mxu0 %v5557_v54  ;;  %v4971_v55 = vand.u32 4294901760, %v1385_v10  ;;  %v1583_v42 = vsub.f32 %v4937_v51, %v1582_v61  ;;  %v1602_v26 = vand.u32 4294901760, %v4965_v9 }
 0x13e   : > { %3707 = vmatprep.subr.mxu1 %v5558_v30  ;;  %3571 = vmatmul.mubr.f32.gmra.mxu0 %v1544_v63  ;;  %v4954_v50 = vand.u32 4294901760, %v1384_v22  ;;  %v1592_v33 = vand.u32 4294901760, %v4950_v2  ;;  %v1574_v15 = vand.u32 4294901760, %v1573_v35  ;;  %v5564_v63 = vld [vmem:[#allocation34_spill] sm:$0xff] }
 0x13f   : > { %3630 = vmatmul.mubr.f32.gmra.mxu1 %v4912_v49  ;;  %3647 = vmatpush3.msra.mxu0 %v5557_v54  ;;  %v1584_v54 = vand.u32 4294901760, %v1583_v42  ;;  %v1603_v35 = vsub.f32 %v4965_v9, %v1602_v26  ;;  %v5568_v42 = vld [vmem:[#allocation41_spill] sm:$0xff] }
 0x140   : > { %3708 = vmatpush3.msra.mxu1 %v5558_v30  ;;  %3648 = vmatprep.subr.mxu0 %v5559_v28  ;;  %v4974_v56 = vsub.f32 %v1384_v22, %v4954_v50  ;;  %v1593_v25 = vsub.f32 %v4950_v2, %v1592_v33  ;;  %v4991_v22 = vsub.f32 %v1385_v10, %v4971_v55 }
 0x141   : > { %3709 = vmatprep.subr.mxu1 %v5560_v44  ;;  %3649 = vmatpush3.msra.mxu0 %v5559_v28  ;;  %v5566_v28 = vld [vmem:[#allocation38_spill] sm:$0xff] }
 0x142   : > { %3710 = vmatpush3.msra.mxu1 %v5560_v44  ;;  %3573 = vmatprep.mubr.f32.mxu0 %v1554_v14  ;;  %v5487_v14 = vand.u32 4294901760, %v4974_v56  ;;  %v1594_v10 = vand.u32 4294901760, %v1593_v25  ;;  %v5569_v25 = vld [vmem:[#allocation33_spill] sm:$0xff] }
 0x143   : > { %3632 = vmatprep.mubr.f32.mxu1 %v4932_v60  ;;  %3650 = vmatprep.subr.mxu0 %v5561_v52 }
 0x144   : > { %3711 = vmatprep.subr.mxu1 %v5562_v62  ;;  %3574 = vmatmul.mubr.f32.gmra.mxu0 %v1564_v21  ;;  %v5567_v21 = vld [vmem:[#allocation32_spill] sm:$0xff] }
 0x145   : > { %3633 = vmatmul.mubr.f32.gmra.mxu1 %v4943_v11  ;;  %3651 = vmatpush3.msra.mxu0 %v5561_v52  ;;  %v1613_v52 = vsub.f32 %v4974_v56, %v5487_v14 }
 0x146   : > { %3712 = vmatpush3.msra.mxu1 %v5562_v62  ;;  %3652 = vmatprep.subr.mxu0 %v5563_v46 }
 0x147   : > { %3713 = vmatprep.subr.mxu1 %v5564_v63  ;;  %3653 = vmatpush3.msra.mxu0 %v5563_v46  ;;  %v1604_v46 = vand.u32 4294901760, %v1603_v35  ;;  %v5573_v35 = vld [vmem:[#allocation40_spill] sm:$0xff] }
 0x148   : > { %3714 = vmatpush3.msra.mxu1 %v5564_v63  ;;  %3576 = vmatprep.mubr.f32.mxu0 %v1574_v15  ;;  %v1622_v15 = vand.u32 4294901760, %v4991_v22 }
 0x149   : > { %3635 = vmatprep.mubr.f32.mxu1 %v4954_v50  ;;  %3654 = vmatprep.subr.mxu0 %v5565_v41 }
 0x14a   : > { %3715 = vmatprep.subr.mxu1 %v5566_v28  ;;  %3577 = vmatmul.mubr.f32.gmra.mxu0 %v1584_v54  ;;  %v5570_v54 = vld [vmem:[#allocation44_spill] sm:$0xff]  ;;  %v1623_v14 = vsub.f32 %v4991_v22, %v1622_v15 }
 0x14b   : > { %3636 = vmatmul.mubr.f32.gmra.mxu1 %v4971_v55  ;;  %3655 = vmatpush3.msra.mxu0 %v5565_v41  ;;  %v1614_v41 = vand.u32 4294901760, %v1613_v52  ;;  %v5574_v52 = vld [vmem:[#allocation43_spill] sm:$0xff] }
 0x14c   : > { %3716 = vmatpush3.msra.mxu1 %v5566_v28  ;;  %3656 = vmatprep.subr.mxu0 %v5567_v21 }
 0x14d   : > { %3717 = vmatprep.subr.mxu1 %v5568_v42  ;;  %3723 = vmatprep.mubr.f32.mxu1 %v1492_v16  ;;  %v5571_v16 = vld [vmem:[#allocation37_spill] sm:$0xff] }
 0x14e   : > { %3657 = vmatpush3.msra.mxu0 %v5567_v21  ;;  %3718 = vmatpush3.msra.mxu1 %v5568_v42  ;;  %v5572_v21 = vld [vmem:[#allocation47_spill] sm:$0xff] }
 0x14f   : > { %3579 = vmatprep.mubr.f32.mxu0 %v1594_v10  ;;  %3658 = vmatprep.subr.mxu0 %v5569_v25  ;;  %v1624_v10 = vand.u32 4294901760, %v1623_v14 }
 0x150   : > { %3719 = vmatprep.subr.mxu1 %v5570_v54  ;;  %3580 = vmatmul.mubr.f32.gmra.mxu0 %v1604_v46 }
 0x151   : > { %3659 = vmatpush3.msra.mxu0 %v5569_v25  ;;  %3720 = vmatpush3.msra.mxu1 %v5570_v54 }
 0x152   : > { %3660 = vmatprep.subr.mxu0 %v5571_v16  ;;  %3721 = vmatprep.subr.mxu1 %v5572_v21 }
 0x153   : > { %3661 = vmatpush3.msra.mxu0 %v5571_v16  ;;  %3722 = vmatpush3.msra.mxu1 %v5572_v21 }
 0x154   : > { %3582 = vmatprep.mubr.f32.mxu0 %v1614_v41  ;;  %3662 = vmatprep.subr.mxu0 %v5573_v35 }
 0x155   : > { %3724 = vmatmul.mubr.f32.vlgmr.msra.gmra.mxu1 %v1502_v59  ;;  %3797 = vmatprep.subr.mxu1 %v5544_v45  ;;  %v5575_v59 = vld [vmem:[#allocation46_spill] sm:$0xff] }
 0x156   : > { %3583 = vmatmul.mubr.f32.gmra.mxu0 %v1624_v10  ;;  %3726 = vmatprep.mubr.f32.mxu1 %v1512_v13  ;;  %v5585_v13 = vld [vmem:[#allocation27_spill] sm:$0xff] }
 0x157   : > { %3663 = vmatpush3.msra.mxu0 %v5573_v35  ;;  %3798 = vmatpush3.msra.mxu1 %v5544_v45  ;;  %v5577_v45 = vld [vmem:[#allocation6_spill] sm:$0xff] }
 0x158   : > { %3664 = vmatprep.subr.mxu0 %v5574_v52  ;;  %3670 = vmatprep.mubr.f32.mxu0 %v4818_v58  ;;  %v5576_v58 = vld [vmem:[#allocation49_spill] sm:$0xff] }
 0x159   : > { %3799 = vmatprep.subr.mxu1 %v5545_v34  ;;  %3665 = vmatpush3.msra.mxu0 %v5574_v52 }
 0x15a   : > { %3800 = vmatpush3.msra.mxu1 %v5545_v34  ;;  %3666 = vmatprep.subr.mxu0 %v5575_v59  ;;  %v5578_v34 = vld [vmem:[#allocation9_spill] sm:$0xff] }
 0x15b   : > { %3727 = vmatmul.mubr.f32.gmra.mxu1 %v1522_v3  ;;  %3801 = vmatprep.subr.mxu1 %v5546_v0  ;;  %v5583_v3 = vld [vmem:[#allocation24_spill] sm:$0xff] }
 0x15c   : > { %3667 = vmatpush3.msra.mxu0 %v5575_v59  ;;  %3729 = vmatprep.mubr.f32.mxu1 %v1532_v36  ;;  %v5589_v36 = vld [vmem:[#allocation39_spill] sm:$0xff] }
 0x15d   : > { %3802 = vmatpush3.msra.mxu1 %v5546_v0  ;;  %3668 = vmatprep.subr.mxu0 %v5576_v58  ;;  %v5582_v0 = vld [vmem:[#allocation21_spill] sm:$0xff] }
 0x15e   : > { %3803 = vmatprep.subr.mxu1 %v5547_v19  ;;  %3669 = vmatpush3.msra.mxu0 %v5576_v58 }
 0x15f   : > { %3804 = vmatpush3.msra.mxu1 %v5547_v19  ;;  %3671 = vmatmul.mubr.f32.vlgmr.msra.gmra.mxu0 %v4809_v37  ;;  %v5579_v37 = vld [vmem:[#allocation12_spill] sm:$0xff]  ;;  %v5587_v19 = vld [vmem:[#allocation35_spill] sm:$0xff] }
 0x160   : > { %3730 = vmatmul.mubr.f32.gmra.mxu1 %v1542_v40  ;;  %3744 = vmatprep.subr.mxu0 %v5577_v45  ;;  %v5590_v40 = vld [vmem:[#allocation42_spill] sm:$0xff] }
 0x161   : > { %3805 = vmatprep.subr.mxu1 %v5548_v39  ;;  %3673 = vmatprep.mubr.f32.mxu0 %v4847_v17  ;;  %v5580_v17 = vld [vmem:[#allocation15_spill] sm:$0xff] }
 0x162   : > { %3732 = vmatprep.mubr.f32.mxu1 %v1552_v38  ;;  %3745 = vmatpush3.msra.mxu0 %v5577_v45 }
 0x163   : > { %3806 = vmatpush3.msra.mxu1 %v5548_v39  ;;  %3746 = vmatprep.subr.mxu0 %v5578_v34  ;;  %v5588_v39 = vld [vmem:[#allocation36_spill] sm:$0xff] }
 0x164   : > { %3807 = vmatprep.subr.mxu1 %v5552_v43  ;;  %3747 = vmatpush3.msra.mxu0 %v5578_v34 }
 0x165   : > { %3808 = vmatpush3.msra.mxu1 %v5552_v43  ;;  %3674 = vmatmul.mubr.f32.gmra.mxu0 %v4830_v1  ;;  %v5581_v1 = vld [vmem:[#allocation20_spill] sm:$0xff] }
 0x166   : > { %3733 = vmatmul.mubr.f32.gmra.mxu1 %v1562_v53  ;;  %3748 = vmatprep.subr.mxu0 %v5579_v37  ;;  %v5592_v43 = vld [vmem:[#allocation48_spill] sm:$0xff] }
 0x167   : > { %3809 = vmatprep.subr.mxu1 %v5554_v18  ;;  %3676 = vmatprep.mubr.f32.mxu0 %v4869_v5  ;;  %v5586_v5 = vld [vmem:[#allocation30_spill] sm:$0xff] }
 0x168   : > { %3735 = vmatprep.mubr.f32.mxu1 %v1572_v8  ;;  %3749 = vmatpush3.msra.mxu0 %v5579_v37 }
 0x169   : > { %3810 = vmatpush3.msra.mxu1 %v5554_v18  ;;  %3750 = vmatprep.subr.mxu0 %v5580_v17 }
 0x16a   : > { %3811 = vmatprep.subr.mxu1 %v5556_v6  ;;  %3751 = vmatpush3.msra.mxu0 %v5580_v17  ;;  %v5232_v17 = vld [vmem:[%s5390_s4] ss:$0 sm:$0xff] }
 0x16b   : > { %3812 = vmatpush3.msra.mxu1 %v5556_v6  ;;  %3677 = vmatmul.mubr.f32.gmra.mxu0 %v4864_v29  ;;  %v5584_v29 = vand.u32 4294901760, %v4974_v56 }
 0x16c   : > { %3736 = vmatmul.mubr.f32.gmra.mxu1 %v1582_v61  ;;  %3752 = vmatprep.subr.mxu0 %v5581_v1 }
 0x16d   : > { %3813 = vmatprep.subr.mxu1 %v5558_v30  ;;  %3679 = vmatprep.mubr.f32.mxu0 %v4893_v20  ;;  %v5591_v20 = vld [vmem:[#allocation45_spill] sm:$0xff] }
 0x16e   : > { %3738 = vmatprep.mubr.f32.mxu1 %v1592_v33  ;;  %3753 = vmatpush3.msra.mxu0 %v5581_v1 }
 0x16f   : > { %3814 = vmatpush3.msra.mxu1 %v5558_v30  ;;  %3754 = vmatprep.subr.mxu0 %v5582_v0 }
 0x170   : > { %3815 = vmatprep.subr.mxu1 %v5560_v44  ;;  %3755 = vmatpush3.msra.mxu0 %v5582_v0 }
 0x171   : > { %3816 = vmatpush3.msra.mxu1 %v5560_v44  ;;  %3680 = vmatmul.mubr.f32.gmra.mxu0 %v4907_v32  ;;  %v5593_v32 = vld [vmem:[#allocation50_spill] sm:$0xff] }
 0x172   : > { %3739 = vmatmul.mubr.f32.gmra.mxu1 %v1602_v26  ;;  %3756 = vmatprep.subr.mxu0 %v5583_v3 }
 0x173   : > { %3817 = vmatprep.subr.mxu1 %v5562_v62  ;;  %3682 = vmatprep.mubr.f32.mxu0 %v4921_v48 }
 0x174   : > { %3741 = vmatprep.mubr.f32.mxu1 %v5584_v29  ;;  %3757 = vmatpush3.msra.mxu0 %v5583_v3 }
 0x175   : > { %3818 = vmatpush3.msra.mxu1 %v5562_v62  ;;  %3758 = vmatprep.subr.mxu0 %v5585_v13 }
 0x176   : > { %3819 = vmatprep.subr.mxu1 %v5564_v63  ;;  %3759 = vmatpush3.msra.mxu0 %v5585_v13 }
 0x177   : > { %3820 = vmatpush3.msra.mxu1 %v5564_v63  ;;  %3683 = vmatmul.mubr.f32.gmra.mxu0 %v4937_v51 }
 0x178   : > { %3742 = vmatmul.mubr.f32.gmra.mxu1 %v1622_v15  ;;  %3760 = vmatprep.subr.mxu0 %v5586_v5 }
 0x179   : > { %3821 = vmatprep.subr.mxu1 %v5566_v28  ;;  %3685 = vmatprep.mubr.f32.mxu0 %v4950_v2 }
 0x17a   : > { %3761 = vmatpush3.msra.mxu0 %v5586_v5  ;;  %3822 = vmatpush3.msra.mxu1 %v5566_v28 }
 0x17b   : > { %3829 = vmatprep.mubr.f32.mxu1 %v4811_v24  ;;  %3762 = vmatprep.subr.mxu0 %v5587_v19 }
 0x17c   : > { %3823 = vmatprep.subr.mxu1 %v5568_v42  ;;  %3763 = vmatpush3.msra.mxu0 %v5587_v19 }
 0x17d   : > { %3824 = vmatpush3.msra.mxu1 %v5568_v42  ;;  %3686 = vmatmul.mubr.f32.gmra.mxu0 %v4965_v9 }
 0x17e   : > { %3764 = vmatprep.subr.mxu0 %v5588_v39  ;;  %3825 = vmatprep.subr.mxu1 %v5570_v54 }
 0x17f   : > { %3688 = vmatprep.mubr.f32.mxu0 %v4974_v56  ;;  %3765 = vmatpush3.msra.mxu0 %v5588_v39 }
 0x180   : > { %3826 = vmatpush3.msra.mxu1 %v5570_v54  ;;  %3766 = vmatprep.subr.mxu0 %v5589_v36 }
 0x181   : > { %3827 = vmatprep.subr.mxu1 %v5572_v21  ;;  %3767 = vmatpush3.msra.mxu0 %v5589_v36 }
 0x182   : > { %3828 = vmatpush3.msra.mxu1 %v5572_v21  ;;  %3689 = vmatmul.mubr.f32.gmra.mxu0 %v4991_v22 }
 0x183   : > { %3768 = vmatprep.subr.mxu0 %v5590_v40  ;;  %3830 = vmatmul.mubr.f32.vlgmr.msra.gmra.mxu1 %v4802_v7 }
 0x184   : > { %3769 = vmatpush3.msra.mxu0 %v5590_v40  ;;  %3776 = vmatprep.mubr.f32.mxu0 %v4811_v24 }
 0x185   : > { %3832 = vmatprep.mubr.f32.mxu1 %v4836_v47  ;;  %3770 = vmatprep.subr.mxu0 %v5591_v20 }
 0x186   : > { %3771 = vmatpush3.msra.mxu0 %v5591_v20 }
 0x187   : > { %3772 = vmatprep.subr.mxu0 %v5592_v43  ;;  %3833 = vmatmul.mubr.f32.gmra.mxu1 %v4820_v27 }
 0x188   : > { %3773 = vmatpush3.msra.mxu0 %v5592_v43  ;;  %3835 = vmatprep.mubr.f32.mxu1 %v4857_v31 }
 0x189   : > { %3774 = vmatprep.subr.mxu0 %v5593_v32 }
 0x18a   : > { %3775 = vmatpush3.msra.mxu0 %v5593_v32 }
 0x18b   : > { %3777 = vmatmul.mubr.f32.vlgmr.msra.gmra.mxu0 %v4802_v7  ;;  %3836 = vmatmul.mubr.f32.gmra.mxu1 %v4849_v4 }
 0x18c   : > { %3779 = vmatprep.mubr.f32.mxu0 %v4836_v47  ;;  %3838 = vmatprep.mubr.f32.mxu1 %v4884_v57 }
 0x18f   : > { %3780 = vmatmul.mubr.f32.gmra.mxu0 %v4820_v27  ;;  %3839 = vmatmul.mubr.f32.gmra.mxu1 %v4882_v23 }
 0x190   : > { %3782 = vmatprep.mubr.f32.mxu0 %v4857_v31  ;;  %3841 = vmatprep.mubr.f32.mxu1 %v4909_v12 }
 0x193   : > { %3783 = vmatmul.mubr.f32.gmra.mxu0 %v4849_v4  ;;  %3842 = vmatmul.mubr.f32.gmra.mxu1 %v4912_v49 }
 0x194   : > { %3785 = vmatprep.mubr.f32.mxu0 %v4884_v57  ;;  %3844 = vmatprep.mubr.f32.mxu1 %v4932_v60 }
 0x197   : > { %3786 = vmatmul.mubr.f32.gmra.mxu0 %v4882_v23  ;;  %3845 = vmatmul.mubr.f32.gmra.mxu1 %v4943_v11 }
 0x198   : > { %3788 = vmatprep.mubr.f32.mxu0 %v4909_v12  ;;  %3847 = vmatprep.mubr.f32.mxu1 %v4954_v50 }
 0x19b   : > { %3789 = vmatmul.mubr.f32.gmra.mxu0 %v4912_v49  ;;  %3848 = vmatmul.mubr.f32.gmra.mxu1 %v4971_v55 }
 0x19c   : > { %3791 = vmatprep.mubr.f32.mxu0 %v4932_v60 }
 0x19f   : > { %3792 = vmatmul.mubr.f32.gmra.mxu0 %v4943_v11 }
 0x1a0   : > { %3794 = vmatprep.mubr.f32.mxu0 %v4954_v50 }
 0x1a3   : > { %3795 = vmatmul.mubr.f32.gmra.mxu0 %v4971_v55 }
 0x1e9   : > { %v3619_v7 = vpop.f32.mrf.mxu1 }
 0x1eb   : > { %v5165_v24 = vpop.f32.mrf.mxu1 }
 0x1ee   : > { %v5167_v27 = vpop.f32.mrf.mxu1 }
 0x1f0   : > { %v5169_v47 = vpop.f32.mrf.mxu1 }
 0x1f2   : > { %v3566_v4 = vpop.f32.mrf.mxu0 }
 0x1f3   : > { %v5171_v31 = vpop.f32.mrf.mxu1  ;;  %v1507_v3 = vadd.f32 %v3566_v4, %v5232_v17 }
 0x1f4   : > { %v1496_v23 = vpop.f32.mrf.mxu0 }
 0x1f5   : > { %v5173_v57 = vpop.f32.mrf.mxu1  ;;  %v1497_v5 = vadd.f32 %v5232_v17, %v1496_v23  ;;  %v1784_v36 = vadd.f32 %v3619_v7, %v1507_v3 }
 0x1f8   : > { %v3569_v12 = vpop.f32.mrf.mxu0 }
 0x1f9   : > { %v5175_v49 = vpop.f32.mrf.mxu1  ;;  %v1527_v39 = vadd.f32 %v3569_v12, %v5232_v17 }
 0x1fa   : > { %v1516_v38 = vpop.f32.mrf.mxu0 }
 0x1fb   : > { %v5177_v48 = vpop.f32.mrf.mxu1  ;;  %v1517_v43 = vadd.f32 %v5232_v17, %v1516_v38 }
 0x1fd   : > { %v1790_v3 = vadd.f32 %v5169_v47, %v1517_v43 }
 0x1fe   : > { %v3572_v18 = vpop.f32.mrf.mxu0 }
 0x1ff   : > { %v5179_v53 = vpop.f32.mrf.mxu1  ;;  %v1547_v4 = vadd.f32 %v3572_v18, %v5232_v17 }
 0x200   : > { %v1536_v60 = vpop.f32.mrf.mxu0 }
 0x201   : > { %v5181_v6 = vpop.f32.mrf.mxu1  ;;  %v1537_v23 = vadd.f32 %v5232_v17, %v1536_v60 }
 0x203   : > { %v1802_v60 = vadd.f32 %v5173_v57, %v1537_v23 }
 0x204   : > { %v3575_v51 = vpop.f32.mrf.mxu0 }
 0x205   : > { %v5185_v11 = vpop.f32.mrf.mxu1  ;;  %v1567_v38 = vadd.f32 %v3575_v51, %v5232_v17 }
 0x206   : > { %v5183_v8 = vpop.f32.mrf.mxu0 }
 0x207   : > { %v5189_v2 = vpop.f32.mrf.mxu1 }
 0x20a   : > { %v5187_v30 = vpop.f32.mrf.mxu0 }
 0x20b   : > { %v5193_v61 = vpop.f32.mrf.mxu1  ;;  %v1587_v51 = vadd.f32 %v5187_v30, %v5232_v17 }
 0x20c   : > { %v5191_v50 = vpop.f32.mrf.mxu0 }
 0x20d   : > { %v5197_v9 = vpop.f32.mrf.mxu1  ;;  %v1577_v57 = vadd.f32 %v5232_v17, %v5191_v50 }
 0x20e   : > { %5594 = vst [vmem:[#allocation51_spill] sm:$0xff] %v5197_v9 }
 0x210   : > { %v5195_v44 = vpop.f32.mrf.mxu0 }
 0x212   : > { %v5199_v33 = vpop.f32.mrf.mxu0 }
 0x215   : > { %v3725_v55 = vpop.f32.mrf.mxu1 }
 0x216   : > { %v5201_v62 = vpop.f32.mrf.mxu0 }
 0x217   : > { %v2139_v56 = vpop.f32.mrf.mxu1 }
 0x218   : > { %v5203_v63 = vpop.f32.mrf.mxu0 }
 0x21b   : > { %v3728_v26 = vpop.f32.mrf.mxu1 }
 0x21d   : > { %v5205_v22 = vpop.f32.mrf.mxu1 }
 0x21f   : > { %v3672_v14 = vpop.f32.mrf.mxu0 }
 0x220   : > { %v5207_v28 = vpop.f32.mrf.mxu1  ;;  %v1967_v32 = vadd.f32 %v3672_v14, %v1784_v36 }
 0x221   : > { %v1959_v15 = vpop.f32.mrf.mxu0 }
 0x222   : > { %v5209_v42 = vpop.f32.mrf.mxu1 }
 0x225   : > { %v3675_v46 = vpop.f32.mrf.mxu0 }
 0x226   : > { %v5211_v25 = vpop.f32.mrf.mxu1 }
 0x227   : > { %v1973_v54 = vpop.f32.mrf.mxu0 }
 0x228   : > { %v5213_v41 = vpop.f32.mrf.mxu1 }
 0x22b   : > { %v3678_v16 = vpop.f32.mrf.mxu0 }
 0x22c   : > { %v5215_v21 = vpop.f32.mrf.mxu1 }
 0x22d   : > { %v1987_v35 = vpop.f32.mrf.mxu0 }
 0x22e   : > { %v5217_v10 = vpop.f32.mrf.mxu1 }
 0x231   : > { %v3681_v52 = vpop.f32.mrf.mxu0 }
 0x232   : > { %v5221_v58 = vpop.f32.mrf.mxu1 }
 0x233   : > { %v5219_v59 = vpop.f32.mrf.mxu0  ;;  %5595 = vst [vmem:[#allocation52_spill] sm:$0xff] %v5221_v58  ;;  %v1796_v58 = vadd.f32 %v5167_v27, %v1527_v39  ;;  %v1557_v27 = vadd.f32 %v5232_v17, %v5183_v8 }
 0x234   : > { %v5225_v34 = vpop.f32.mrf.mxu1 }
 0x235   : > { %5596 = vst [vmem:[#allocation53_spill] sm:$0xff] %v5225_v34  ;;  %v1981_v7 = vadd.f32 %v3675_v46, %v1796_v58 }
 0x237   : > { %v5223_v45 = vpop.f32.mrf.mxu0 }
 0x238   : > { %v5234_v1 = vpop.f32.mrf.mxu1 }
 0x239   : > { %v5227_v37 = vpop.f32.mrf.mxu0  ;;  %5597 = vst [vmem:[#allocation3_spill] sm:$0xff] %v5234_v1  ;;  %v1778_v1 = vadd.f32 %v5165_v24, %v1497_v5  ;;  %v1974_v24 = vadd.f32 %v1973_v54, %v1790_v3  ;;  %v1808_v5 = vadd.f32 %v5171_v31, %v1547_v4  ;;  %v1820_v54 = vadd.f32 %v5175_v49, %v1567_v38 }
 0x23a   : > { %v5239_v29 = vpop.f32.mrf.mxu1  ;;  %v1826_v3 = vadd.f32 %v5181_v6, %v1577_v57 }
 0x23b   : > { %5598 = vst [vmem:[#allocation5_spill] sm:$0xff] %v5239_v29  ;;  %v1960_v29 = vadd.f32 %v1959_v15, %v1778_v1  ;;  %v1995_v46 = vadd.f32 %v3678_v16, %v1808_v5  ;;  %v2156_v8 = vadd.f32 %v5205_v22, %v1974_v24  ;;  %v1814_v16 = vadd.f32 %v5177_v48, %v1557_v27 }
 0x23d   : > { %v5236_v0 = vpop.f32.mrf.mxu0  ;;  %v2140_v15 = vadd.f32 %v2139_v56, %v1960_v29  ;;  %v2180_v49 = vadd.f32 %v5207_v28, %v1995_v46  ;;  %v2002_v50 = vadd.f32 %v5219_v59, %v1814_v16  ;;  %v1627_v59 = vadd.f32 %v5201_v62, %v5232_v17 }
 0x23f   : > { %v5241_v13 = vpop.f32.mrf.mxu0 }
 0x242   : > { %v5245_v40 = vpop.f32.mrf.mxu0 }
 0x243   : > { %v3831_v19 = vpop.f32.mrf.mxu1  ;;  %5599 = vst [vmem:[#allocation8_spill] sm:$0xff] %v5245_v40  ;;  %v2148_v40 = vadd.f32 %v3725_v55, %v1967_v32  ;;  %v2164_v55 = vadd.f32 %v3728_v26, %v1981_v7  ;;  %v2009_v32 = vadd.f32 %v3681_v52, %v1820_v54 }
 0x244   : > { %v5252_v9 = vpop.f32.mrf.mxu0 }
 0x245   : > { %v2527_v20 = vpop.f32.mrf.mxu1 }
 0x247   : > { %v3834_v34 = vpop.f32.mrf.mxu1 }
 0x249   : > { %v2539_v12 = vpop.f32.mrf.mxu1 }
 0x24b   : > { %v3778_v14 = vpop.f32.mrf.mxu0  ;;  %v3837_v36 = vpop.f32.mrf.mxu1 }
 0x24c   : > { %v2369_v18 = vadd.f32 %v3778_v14, %v2148_v40  ;;  %v1988_v40 = vadd.f32 %v1987_v35, %v1802_v60  ;;  %v1607_v35 = vadd.f32 %v5195_v44, %v5232_v17  ;;  %v2196_v44 = vadd.f32 %v5211_v25, %v2009_v32 }
 0x24d   : > { %v2362_v1 = vpop.f32.mrf.mxu0  ;;  %v2551_v39 = vpop.f32.mrf.mxu1  ;;  %v1617_v25 = vadd.f32 %v5232_v17, %v5203_v63 }
 0x24e   : > { %v2534_v58 = vadd.f32 %v3831_v19, %v2369_v18  ;;  %v2363_v47 = vadd.f32 %v2362_v1, %v2140_v15  ;;  %v2172_v48 = vadd.f32 %v5209_v42, %v1988_v40  ;;  %v2188_v18 = vadd.f32 %v5213_v41, %v2002_v50  ;;  %v5605_v50 = vld [vmem:[#allocation5_spill] sm:$0xff] }
 0x24f   : > { %v3781_v43 = vpop.f32.mrf.mxu0  ;;  %v3840_v31 = vpop.f32.mrf.mxu1  ;;  %v1856_v41 = vadd.f32 %v5193_v61, %v1627_v59  ;;  %v5603_v61 = vld [vmem:[#allocation53_spill] sm:$0xff] }
 0x250   : > { %v2528_v56 = vadd.f32 %v2527_v20, %v2363_v47  ;;  %v2381_v29 = vadd.f32 %v3781_v43, %v2164_v55  ;;  %3940 = vtanh.f32 %v2534_v58  ;;  %v1832_v20 = vadd.f32 %v5179_v53, %v1587_v51  ;;  %v5601_v58 = vld [vmem:[#allocation52_spill] sm:$0xff] }
 0x251   : > { %v2374_v26 = vpop.f32.mrf.mxu0  ;;  %v2563_v19 = vpop.f32.mrf.mxu1  ;;  %v5602_v51 = vld [vmem:[#allocation8_spill] sm:$0xff] }
 0x252   : > { %3942 = vtanh.f32 %v2528_v56  ;;  %v2546_v30 = vadd.f32 %v3834_v34, %v2381_v29  ;;  %v2375_v4 = vadd.f32 %v2374_v26, %v2156_v8  ;;  %v1597_v34 = vadd.f32 %v5232_v17, %v5199_v33 }
 0x253   : > { %v3784_v22 = vpop.f32.mrf.mxu0  ;;  %v3843_v23 = vpop.f32.mrf.mxu1  ;;  %v2023_v53 = vadd.f32 %v5223_v45, %v1832_v20  ;;  %v2016_v33 = vadd.f32 %v5227_v37, %v1826_v3 }
 0x254   : > { %v2540_v52 = vadd.f32 %v2539_v12, %v2375_v4  ;;  %v2393_v7 = vadd.f32 %v3784_v22, %v2180_v49  ;;  %3944 = vtanh.f32 %v2546_v30  ;;  %v1844_v12 = vadd.f32 %v5185_v11, %v1607_v35  ;;  %v5604_v30 = vld [vmem:[#allocation3_spill] sm:$0xff] }
 0x255   : > { %v2386_v28 = vpop.f32.mrf.mxu0  ;;  %v2575_v42 = vpop.f32.mrf.mxu1  ;;  %v2212_v27 = vadd.f32 %v5215_v21, %v2023_v53  ;;  %v2204_v17 = vadd.f32 %v5217_v10, %v2016_v33  ;;  %v2051_v21 = vadd.f32 %v5602_v51, %v1856_v41 }
 0x256   : > { %3946 = vtanh.f32 %v2540_v52  ;;  %v2558_v38 = vadd.f32 %v3837_v36, %v2393_v7  ;;  %v2387_v14 = vadd.f32 %v2386_v28, %v2172_v48  ;;  %v2037_v45 = vadd.f32 %v5236_v0, %v1844_v12  ;;  %v5600_v0 = vld [vmem:[#allocation51_spill] sm:$0xff] }
 0x257   : > { %v3787_v24 = vpop.f32.mrf.mxu0  ;;  %v1838_v36 = vadd.f32 %v5189_v2, %v1597_v34  ;;  %v3846_v60 = vpop.f32.mrf.mxu1  ;;  %v1850_v2 = vadd.f32 %v5600_v0, %v1617_v25  ;;  %v2244_v4 = vadd.f32 %v5604_v30, %v2051_v21 }
 0x258   : > { %v2552_v6 = vadd.f32 %v2551_v39, %v2387_v14  ;;  %v2405_v5 = vadd.f32 %v3787_v24, %v2196_v44  ;;  %3948 = vtanh.f32 %v2558_v38  ;;  %v2228_v47 = vadd.f32 %v5601_v58, %v2037_v45 }
 0x259   : > { %v2398_v62 = vpop.f32.mrf.mxu0  ;;  %v2030_v37 = vadd.f32 %v5241_v13, %v1838_v36  ;;  %v2044_v29 = vadd.f32 %v5252_v9, %v1850_v2 }
 0x25a   : > { %3950 = vtanh.f32 %v2552_v6  ;;  %v2570_v11 = vadd.f32 %v3840_v31, %v2405_v5  ;;  %v2399_v15 = vadd.f32 %v2398_v62, %v2188_v18  ;;  %v2587_v31 = vpop.f32.mrf.mxu1 }
 0x25b   : > { %v3790_v1 = vpop.f32.mrf.mxu0  ;;  %v2220_v56 = vadd.f32 %v5603_v61, %v2030_v37  ;;  %v2236_v52 = vadd.f32 %v5605_v50, %v2044_v29 }
 0x25c   : > { %v2564_v39 = vadd.f32 %v2563_v19, %v2399_v15  ;;  %v2417_v63 = vadd.f32 %v3790_v1, %v2212_v27  ;;  %3952 = vtanh.f32 %v2570_v11  ;;  %v3849_v35 = vpop.f32.mrf.mxu1 }
 0x25d   : > { %v2410_v46 = vpop.f32.mrf.mxu0  ;;  %v3941_v55 = vpop.eup %3940 }
 0x25e   : > { %3954 = vtanh.f32 %v2564_v39  ;;  %v2582_v13 = vadd.f32 %v3843_v23, %v2417_v63  ;;  %v2411_v54 = vadd.f32 %v2410_v46, %v2204_v17  ;;  %v2599_v44 = vpop.f32.mrf.mxu1 }
 0x25f   : > { %v3943_v43 = vpop.eup %3942  ;;  %v3793_v40 = vpop.f32.mrf.mxu0 }
 0x260   : > { %v3014_v10 = vpack.c.bf16 %v3941_v55, %v3943_v43  ;;  %v2576_v8 = vadd.f32 %v2575_v42, %v2411_v54  ;;  %v2429_v57 = vadd.f32 %v3793_v40, %v2228_v47  ;;  %3956 = vtanh.f32 %v2582_v13 }
 0x261   : > { %v2422_v32 = vpop.f32.mrf.mxu0  ;;  %v3945_v16 = vpop.eup %3944 }
 0x262   : > { %3015 = vst [vmem:[%s5297_s23] sm:$0xff] %v3014_v10   ;;  %3958 = vtanh.f32 %v2576_v8  ;;  %v2594_v26 = vadd.f32 %v3846_v60, %v2429_v57  ;;  %v2423_v19 = vadd.f32 %v2422_v32, %v2220_v56 }
 0x263   : > { %v3947_v49 = vpop.eup %3946  ;;  %v3796_v20 = vpop.f32.mrf.mxu0 }
 0x264   : > { %v3019_v9 = vpack.c.bf16 %v3945_v16, %v3947_v49  ;;  %v2588_v22 = vadd.f32 %v2587_v31, %v2423_v19  ;;  %v2441_v23 = vadd.f32 %v3796_v20, %v2244_v4  ;;  %3960 = vtanh.f32 %v2594_v26 }
 0x265   : > { %v2434_v7 = vpop.f32.mrf.mxu0  ;;  %v3949_v48 = vpop.eup %3948 }
 0x266   : > { %3046 = vst [vmem:[%s5297_s23 + $0x8] sm:$0xff] %v3019_v9   ;;  %3962 = vtanh.f32 %v2588_v22  ;;  %v2606_v34 = vadd.f32 %v3849_v35, %v2441_v23  ;;  %v2435_v3 = vadd.f32 %v2434_v7, %v2236_v52 }
 0x267   : > { %v3951_v28 = vpop.eup %3950 }
 0x268   : > { %v3024_v53 = vpack.c.bf16 %v3949_v48, %v3951_v28  ;;  %v2600_v38 = vadd.f32 %v2599_v44, %v2435_v3  ;;  %3964 = vtanh.f32 %v2606_v34 }
 0x269   : > { %v3953_v14 = vpop.eup %3952 }
 0x26a   : > { %3047 = vst [vmem:[%s5297_s23 + $0x10] sm:$0xff] %v3024_v53   ;;  %3966 = vtanh.f32 %v2600_v38 }
 0x26b   : > { %v3955_v59 = vpop.eup %3954 }
 0x26c   : > { %v3029_v12 = vpack.c.bf16 %v3953_v14, %v3955_v59 }
 0x26d   : > { %v3957_v42 = vpop.eup %3956 }
 0x26e   : > { %3048 = vst [vmem:[%s5297_s23 + $0x18] sm:$0xff] %v3029_v12  }
 0x26f   : > { %v3959_v24 = vpop.eup %3958 }
 0x270   : > { %v3034_v33 = vpack.c.bf16 %v3957_v42, %v3959_v24 }
 0x271   : > { %v3961_v6 = vpop.eup %3960 }
 0x272   : > { %3049 = vst [vmem:[%s5297_s23 + $0x20] sm:$0xff] %v3034_v33  }
 0x273   : > { %v3963_v5 = vpop.eup %3962 }
 0x274   : > { %v3039_v18 = vpack.c.bf16 %v3961_v6, %v3963_v5 }
 0x275   : > { %v3965_v25 = vpop.eup %3964 }
 0x276   : > { %3050 = vst [vmem:[%s5297_s23 + $0x28] sm:$0xff] %v3039_v18   ;;  %2699 = sbr.rel (!%p4115_p4) target bundleno = 698 (0x2ba), region = 44 }
 0x277   : > { %v3967_v45 = vpop.eup %3966 }
 0x278   : > { %v3044_v36 = vpack.c.bf16 %v3965_v25, %v3967_v45 }
 0x27a   : > { %3051 = vst [vmem:[%s5297_s23 + $0x30] sm:$0xff] %v3044_v36  }
 0x27b   : > { %s5613_s24 = smov (!%p2702_p8, %s2701_s24), 14 }
 0x27c   : > { %s2984_s6 = sshll.u32 %s5613_s24, 6 }
 0x27d   : > { %p2987_p9 = scmp.eq.s32.totalorder %s2984_s6, 0 }
 0x27e   : > { %3968 = sdivrem.u32 (!%p2987_p9), %s5613_s24, 14 }
 0x27f   : > { %2710 = sbr.rel (%p2987_p9) target bundleno = 698 (0x2ba), region = 48 }
 0x287   : > { %s5321_s26 = spop.drf %3968 }
 0x288   : > { %p2988_p10 = scmp.le.s32.totalorder %s5321_s26, 0 }
 0x289   : > { %s5606_s21 = smov (!%p2988_p10), %s5315_s30  ;;  %s5607_s8 = smov (!%p2988_p10), %s5297_s23 }
 0x28a   : > { %2919 = sbr.rel (%p2988_p10) target bundleno = 673 (0x2a1), region = 120  ;;  %s5330_s7 = smov (!%p2988_p10), 0  }
 0x28b   : > { %s5332_s9 = smov (!%p2988_p10), 0  }
 0x28f LB: >> { %v2728_v62 = vld [vmem:[%s4034_s8] sm:$0xf]  ;;  %v2730_v11 = vld [vmem:[%s4034_s8 + $0x4] sm:$0xf]  ;;  %v2732_v15 = vld [vmem:[%s4034_s8 + $0x8] sm:$0xf]  ;;  %s4042_s9 = sphi %s5332_s9, %s2722_s9   ;;  %s4038_s7 = sphi %s5330_s7, %s5608_s7   ;;  %s4034_s8 = sphi %s5607_s8, %s2761_s8   ;;  %s4030_s21 = sphi %s5606_s21, %s2762_s21  }
 0x290   : >> { %2729 = vst [vmem:[%s4030_s21] sm:$0xf] %v2728_v62  ;;  %2731 = vst [vmem:[%s4030_s21 + $0x4] sm:$0xf] %v2730_v11  ;;  %v2734_v27 = vld [vmem:[%s4034_s8 + $0xc] sm:$0xf]  ;;  %s2756_s10 = sadd.s32 1, %s4038_s7 }
 0x291   : >> { %2733 = vst [vmem:[%s4030_s21 + $0x8] sm:$0xf] %v2732_v15  ;;  %v2736_v37 = vld [vmem:[%s4034_s8 + $0x10] sm:$0xf]  ;;  %v2738_v60 = vld [vmem:[%s4034_s8 + $0x14] sm:$0xf]  ;;  %p2757_p11 = scmp.ge.s32.totalorder %s2756_s10, %s5321_s26 }
 0x292   : >> { %2735 = vst [vmem:[%s4030_s21 + $0xc] sm:$0xf] %v2734_v27  ;;  %2737 = vst [vmem:[%s4030_s21 + $0x10] sm:$0xf] %v2736_v37  ;;  %v2740_v1 = vld [vmem:[%s4034_s8 + $0x18] sm:$0xf] }
 0x293   : >> { %2739 = vst [vmem:[%s4030_s21 + $0x14] sm:$0xf] %v2738_v60  ;;  %v2742_v41 = vld [vmem:[%s4034_s8 + $0x1c] sm:$0xf]  ;;  %v2744_v39 = vld [vmem:[%s4034_s8 + $0x20] sm:$0xf] }
 0x294   : >> { %2741 = vst [vmem:[%s4030_s21 + $0x18] sm:$0xf] %v2740_v1  ;;  %2743 = vst [vmem:[%s4030_s21 + $0x1c] sm:$0xf] %v2742_v41  ;;  %v2746_v63 = vld [vmem:[%s4034_s8 + $0x24] sm:$0xf] }
 0x295   : >> { %2745 = vst [vmem:[%s4030_s21 + $0x20] sm:$0xf] %v2744_v39  ;;  %v2748_v17 = vld [vmem:[%s4034_s8 + $0x28] sm:$0xf]  ;;  %v2750_v0 = vld [vmem:[%s4034_s8 + $0x2c] sm:$0xf] }
 0x296   : >> { %2747 = vst [vmem:[%s4030_s21 + $0x24] sm:$0xf] %v2746_v63  ;;  %2749 = vst [vmem:[%s4030_s21 + $0x28] sm:$0xf] %v2748_v17  ;;  %v2752_v2 = vld [vmem:[%s4034_s8 + $0x30] sm:$0xf] }
 0x297   : >> { %2751 = vst [vmem:[%s4030_s21 + $0x2c] sm:$0xf] %v2750_v0  ;;  %v2754_v46 = vld [vmem:[%s4034_s8 + $0x34] sm:$0xf]  ;;  %2753 = vst [vmem:[%s4030_s21 + $0x30] sm:$0xf] %v2752_v2 }
 0x298   : >> { %2755 = vst [vmem:[%s4030_s21 + $0x34] sm:$0xf] %v2754_v46  ;;  %s5615_s10 = smov (%p2757_p11, %s2756_s10), 0  ;;  %s2722_s9 = sadd.s32 1, %s4042_s9  }
 0x299   : >> { %s2759_s11 = smul.u32 56, %s5615_s10  ;;  %p2721_p12 = scmp.ge.s32.totalorder %s2722_s9, %s5321_s26 }
 0x29a   : >> { %s5608_s7 = smov %s5615_s10 }
 0x29b   : >> { %s2761_s8 = scalar_lea.vmem %s5297_s23, %s2759_s11 [#allocation2]   ;;  %s2762_s21 = scalar_lea.vmem %s5315_s30, %s2759_s11  }
 0x29c   : > { %2724 = sbr.rel (!%p2721_p12) target bundleno = 655 (0x28f), region = 126 }
 0x2a1 PF: > { %3970 = sdivrem.u32 %s5613_s24, 14 }
 0x2a2   : > { %s2989_s12 = smul.u32 56, %s5321_s26 }
 0x2a4   : > { %s2767_s13 = scalar_lea.vmem %s5297_s23, %s2989_s12 [#allocation2]   ;;  %s2769_s14 = scalar_lea.vmem %s5315_s30, %s2989_s12  }
 0x2aa   : > { %s3971_s15 = spop.drf %3970 }
 0x2ab   : > { %p2991_p13 = scmp.le.s32.totalorder %s3971_s15, 0 }
 0x2ac   : > { %s4044_s16 = smov (!%p2991_p13), %s2769_s14   ;;  %s4048_s17 = smov (!%p2991_p13), %s2767_s13  }
 0x2ad   : > { %2933 = sbr.rel (%p2991_p13) target bundleno = 698 (0x2ba), region = 131  ;;  %s4052_s20 = smov (!%p2991_p13), 0  }
 0x2ae   : > { %s4056_s18 = smov (!%p2991_p13), 0  }
 0x2b2 LB: >> { %v2779_v58 = vld [vmem:[%s4050_s17] sm:$0xf]  ;;  %s2781_s27 = sadd.s32 1, %s4054_s20  ;;  %s2773_s18 = sadd.s32 1, %s4058_s18   ;;  %s4058_s18 = sphi %s4056_s18, %s2773_s18   ;;  %s4054_s20 = sphi %s4052_s20, %s4053_s20   ;;  %s4050_s17 = sphi %s4048_s17, %s2786_s17   ;;  %s4046_s16 = sphi %s4044_s16, %s2787_s16  }
 0x2b3   : >> { %2780 = vst [vmem:[%s4046_s16] sm:$0xf] %v2779_v58  ;;  %p2782_p0 = scmp.ge.s32.totalorder %s2781_s27, %s3971_s15  ;;  %p2772_p1 = scmp.ge.s32.totalorder %s2773_s18, %s3971_s15 }
 0x2b5   : >> { %s5617_s27 = smov (%p2782_p0, %s2781_s27), 0  ;;  %2775 = sbr.rel (!%p2772_p1) target bundleno = 690 (0x2b2), region = 137 }
 0x2b6   : >> { %s2992_s23 = sshll.u32 %s5617_s27, 2  ;;  %s4053_s20 = smov %s5617_s27  }
 0x2b7   : >> { %s2786_s17 = scalar_lea.vmem %s2767_s13, %s2992_s23 [#allocation2]   ;;  %s2787_s16 = scalar_lea.vmem %s2769_s14, %s2992_s23  }
 0x2ba PF: > { %p12_p2 = scmp.ge.s32.totalorder %s4105_s22, 4   ;;  %s5609_s18 = smov %s4022_s19 }
 0x2bb   : > { %s5610_s19 = smov %s4113_s25  ;;  %s5611_s20 = smov %s4105_s22 }
 0x2bc   :  { %14 = sbr.rel (!%p12_p2) target bundleno = 2 (0x2), region = 148 }

</bundles_post_ra>
